<compile_context>
chip_gen: v7x
topology: tpu7x:2x2x1
jax: 0.10.0
libtpu: 0.0.40
codegen_flags: <defaults>
</compile_context>

<pallas_src>
import functools

import jax
import jax.numpy as jnp
from jax import lax
from jax.experimental import pallas as pl
from jax.experimental.pallas import tpu as pltpu

BN_EPS = 1e-5
LANES = 128


def _round_up(x, m):
    return (x + m - 1) // m * m


def _cdiv(a, b):
    return -(-a // b)


def _base_conv_kernel(x_ref, w_ref, s_ref, b_ref, o_ref, *scratch,
                      ksize, stride, cin_p, act, approx_silu):
    """One (padded / phase-folded) image -> one output image."""
    _, Ho, Wo, Cp = o_ref.shape
    K, s = ksize, stride

    if K == 1:
        # 1x1 conv: the wrapper already subsampled for stride, so the whole
        # input block is exactly the im2col matrix.  No scratch needed.
        cols = x_ref[0].reshape(Ho * Wo, x_ref.shape[-1])
    else:
        # Build the im2col slab.  Cin is lane-padded (multiple of 128) and the
        # stride phases are folded into the channel axis by the wrapper, so
        # every slice below is static, unstrided and lane-aligned, and every
        # scratch store is unmasked.
        col_ref = scratch[0]
        for kh in range(K):
            dh, ph = kh // s, kh % s
            for kw in range(K):
                dw, pw = kw // s, kw % s
                c0 = (ph * s + pw) * cin_p
                patch = x_ref[0, pl.ds(dh, Ho), pl.ds(dw, Wo),
                              pl.ds(c0, cin_p)]
                t = kh * K + kw
                col_ref[:, t * cin_p:(t + 1) * cin_p] = (
                    patch.reshape(Ho * Wo, cin_p))
        cols = col_ref[...]

    # Single fused MXU matmul, f32 accumulation (operands may be bf16).
    h = jnp.dot(cols, w_ref[...], preferred_element_type=jnp.float32)

    # Fused eval-mode BatchNorm: per-channel scale/shift (f32).
    h = h * s_ref[...] + b_ref[...]

    # Activation.
    if act == "silu":
        if approx_silu:
            # exp + approximate reciprocal both live on the EUP slot.
            h = h * pl.reciprocal(1.0 + jnp.exp(-h), approx=True)
        else:
            h = h * jax.nn.sigmoid(h)
    elif act == "relu":
        h = jnp.maximum(h, 0.0)
    elif act == "lrelu":
        h = jnp.where(h >= 0.0, h, 0.1 * h)
    elif act == "noact":
        pass
    else:
        raise ValueError(f"Unsupported act: {act}")

    o_ref[0] = h.reshape(Ho, Wo, Cp).astype(o_ref.dtype)


def base_conv_pallas_nhwc(x_nhwc, w_hwio, bn_scale, bn_shift, *, stride=1,
                          padding=None, act="silu", compute_dtype=None,
                          approx_silu=True):
    """BaseConv forward in NHWC.  w_hwio: (K, K, Cin, Cout)."""
    N, H, W, Cin = x_nhwc.shape
    K, _, _, Cout = w_hwio.shape
    s = int(stride)
    pad = (K - 1) // 2 if padding is None else padding
    Ho = (H + 2 * pad - K) // s + 1
    Wo = (W + 2 * pad - K) // s + 1
    dt = jnp.dtype(compute_dtype) if compute_dtype is not None else x_nhwc.dtype

    # Lane-dense channel padding (no-op when channels are already x128).
    Cout_p = _round_up(Cout, LANES)
    Cin_p = Cin if K == 1 else _round_up(Cin, LANES)

    # ---- one-time layout plumbing outside the kernel ------------------------
    x = x_nhwc.astype(dt)
    if K == 1:
        # 1x1: conv zero-pad (usually 0) + stride subsampling in the wrapper;
        # the kernel then sees exactly the im2col matrix.
        if pad:
            x = jnp.pad(x, ((0, 0), (pad, pad), (pad, pad), (0, 0)))
        if s > 1:
            x = x[:, :(Ho - 1) * s + 1:s, :(Wo - 1) * s + 1:s, :]
        else:
            x = x[:, :Ho, :Wo, :]
        Hb, Wb, Cb = Ho, Wo, Cin
    else:
        Hp, Wp = H + 2 * pad, W + 2 * pad
        Hs, Ws = _cdiv(Hp, s), _cdiv(Wp, s)
        # conv zero-pad + phase-fold pad + lane pad.
        x = jnp.pad(x, ((0, 0), (pad, pad + Hs * s - Hp),
                        (pad, pad + Ws * s - Wp), (0, Cin_p - Cin)))
        if s > 1:
            # space-to-depth: fold the s*s stride phases into the channel axis
            # so the kernel never does a strided gather.
            x = x.reshape(N, Hs, s, Ws, s, Cin_p)
            x = x.transpose(0, 1, 3, 2, 4, 5).reshape(N, Hs, Ws, s * s * Cin_p)
            Cb = s * s * Cin_p
        else:
            Cb = Cin_p
        Hb, Wb = Hs, Ws

    w = jnp.pad(w_hwio.astype(dt),
                ((0, 0), (0, 0), (0, Cin_p - Cin), (0, Cout_p - Cout)))
    w = w.reshape(K * K * Cin_p, Cout_p)
    sc = jnp.pad(bn_scale.astype(jnp.float32).reshape(1, Cout),
                 ((0, 0), (0, Cout_p - Cout)))
    sh = jnp.pad(bn_shift.astype(jnp.float32).reshape(1, Cout),
                 ((0, 0), (0, Cout_p - Cout)))

    scratch_shapes = []
    if K > 1:
        scratch_shapes.append(pltpu.VMEM((Ho * Wo, K * K * Cin_p), dt))

    # Explicit VMEM budget (matters most on v7x's 64 MiB VMEM).
    isz = jnp.dtype(dt).itemsize
    blk = 2 * (Hb * Wb * Cb + Ho * Wo * Cout_p) * isz        # dbl-buffered I/O
    blk += K * K * Cin_p * Cout_p * isz + 2 * Cout_p * 4     # weights + BN
    if K > 1:
        blk += Ho * Wo * K * K * Cin_p * isz                 # im2col slab
    blk += Ho * Wo * Cout_p * 4                              # f32 intermediate
    vmem_limit = int(min(100 * 1024 * 1024, max(32 * 1024 * 1024, 2 * blk)))

    kernel = functools.partial(_base_conv_kernel, ksize=K, stride=s,
                               cin_p=Cin_p, act=act, approx_silu=approx_silu)

    out = pl.pallas_call(
        kernel,
        out_shape=jax.ShapeDtypeStruct((N, Ho, Wo, Cout_p), dt),
        grid_spec=pltpu.PrefetchScalarGridSpec(
            num_scalar_prefetch=0,
            grid=(N,),
            in_specs=[
                pl.BlockSpec((1, Hb, Wb, Cb), lambda n: (n, 0, 0, 0)),
                pl.BlockSpec((K * K * Cin_p, Cout_p), lambda n: (0, 0)),
                pl.BlockSpec((1, Cout_p), lambda n: (0, 0)),
                pl.BlockSpec((1, Cout_p), lambda n: (0, 0)),
            ],
            out_specs=pl.BlockSpec((1, Ho, Wo, Cout_p), lambda n: (n, 0, 0, 0)),
            scratch_shapes=scratch_shapes,
        ),
        compiler_params=pltpu.CompilerParams(
            dimension_semantics=("parallel",),
            vmem_limit_bytes=vmem_limit,
        ),
    )(x, w, sc, sh)

    return out[..., :Cout]                       # drop lane padding


@functools.partial(jax.jit, static_argnames=("stride", "padding", "act",
                                             "compute_dtype", "approx_silu"))
def base_conv_pallas(x_nchw, w_hwio, bn_scale, bn_shift, *, stride=1,
                     padding=None, act="silu", compute_dtype=None,
                     approx_silu=True):
    """NCHW adapter matching the PyTorch BaseConv convention."""
    x = jnp.transpose(x_nchw, (0, 2, 3, 1))      # NCHW -> NHWC (once, outside)
    y = base_conv_pallas_nhwc(x, w_hwio, bn_scale, bn_shift, stride=stride,
                              padding=padding, act=act,
                              compute_dtype=compute_dtype,
                              approx_silu=approx_silu)
    return jnp.transpose(y, (0, 3, 1, 2)).astype(x_nchw.dtype)


def base_conv_reference(x_nchw, w_hwio, bn_scale, bn_shift, *, stride=1,
                        padding=None, act="silu"):
    """Pure-JAX reference: Conv2d(bias=False) -> eval BN -> activation."""
    K = w_hwio.shape[0]
    pad = (K - 1) // 2 if padding is None else padding
    x = jnp.transpose(x_nchw, (0, 2, 3, 1)).astype(jnp.float32)
    y = lax.conv_general_dilated(
        x, w_hwio.astype(jnp.float32),
        window_strides=(stride, stride),
        padding=[(pad, pad), (pad, pad)],
        dimension_numbers=("NHWC", "HWIO", "NHWC"),
        precision=lax.Precision.HIGHEST)
    y = y * bn_scale.reshape(1, 1, 1, -1) + bn_shift.reshape(1, 1, 1, -1)
    if act == "silu":
        y = y * jax.nn.sigmoid(y)
    elif act == "relu":
        y = jnp.maximum(y, 0.0)
    elif act == "lrelu":
        y = jnp.where(y >= 0.0, y, 0.1 * y)
    return jnp.transpose(y, (0, 3, 1, 2))


if __name__ == "__main__":
    key = jax.random.PRNGKey(0)
    k1, k2, k3, k4 = jax.random.split(key, 4)

    N, Cin, H, W, Cout, K = 2, 4, 16, 16, 8, 3
    x = jax.random.normal(k1, (N, Cin, H, W), jnp.float32)
    w = (jax.random.normal(k2, (K, K, Cin, Cout), jnp.float32)
         * (2.0 / (K * K * Cin)) ** 0.5)                 # kaiming-ish
    # Eval-mode BatchNorm (gamma=1, beta=0, mean=0, var=1) fused to scale/shift.
    gamma = jnp.ones((Cout,), jnp.float32)
    beta = jnp.zeros((Cout,), jnp.float32)
    mean = jnp.zeros((Cout,), jnp.float32)
    var = jnp.ones((Cout,), jnp.float32)
    scale = gamma / jnp.sqrt(var + BN_EPS)
    shift = beta - mean * scale

    # ---- Case 1: 3x3 stride-1, exact-SiLU path (tight check) ----------------
    out = jax.block_until_ready(
        base_conv_pallas(x, w, scale, shift, stride=1, approx_silu=False))
    ref = base_conv_reference(x, w, scale, shift, stride=1)
    assert out.shape == (N, Cout, H, W), out.shape
    assert jnp.allclose(out, ref, atol=2e-3, rtol=2e-3), (
        float(jnp.max(jnp.abs(out - ref))))

    # ---- Case 2: 3x3 stride-2 (wrapper phase-fold path) ---------------------
    out_s2 = jax.block_until_ready(
        base_conv_pallas(x, w, scale, shift, stride=2, approx_silu=False))
    ref_s2 = base_conv_reference(x, w, scale, shift, stride=2)
    assert out_s2.shape == (N, Cout, H // 2, W // 2), out_s2.shape
    assert jnp.allclose(out_s2, ref_s2, atol=2e-3, rtol=2e-3), (
        float(jnp.max(jnp.abs(out_s2 - ref_s2))))

    # ---- Case 3: 1x1 stride-1 and stride-2 (scratch-free single-dot path) ---
    Cin2, Cout2 = 8, 16
    x2 = jax.random.normal(k3, (N, Cin2, H, W), jnp.float32)
    w2 = (jax.random.normal(k4, (1, 1, Cin2, Cout2), jnp.float32)
          * (2.0 / Cin2) ** 0.5)
    scale2 = jnp.full((Cout2,), 1.0 / jnp.sqrt(1.0 + BN_EPS), jnp.float32)
    shift2 = jnp.zeros((Cout2,), jnp.float32)
    for s2 in (1, 2):
        out2 = jax.block_until_ready(
            base_conv_pallas(x2, w2, scale2, shift2, stride=s2,
                             approx_silu=False))
        ref2 = base_conv_reference(x2, w2, scale2, shift2, stride=s2)
        assert out2.shape == (N, Cout2, H // s2, W // s2), out2.shape
        assert jnp.allclose(out2, ref2, atol=2e-3, rtol=2e-3), (
            float(jnp.max(jnp.abs(out2 - ref2))))

    # ---- Case 4: ReLU activation variant ------------------------------------
    out_r = jax.block_until_ready(
        base_conv_pallas(x, w, scale, shift, stride=1, act="relu"))
    ref_r = base_conv_reference(x, w, scale, shift, stride=1, act="relu")
    assert jnp.allclose(out_r, ref_r, atol=2e-3, rtol=2e-3), (
        float(jnp.max(jnp.abs(out_r - ref_r))))

    # ---- Case 5: bf16 into the MXU + EUP approx-reciprocal SiLU (perf path) -
    out3 = jax.block_until_ready(
        base_conv_pallas(x, w, scale, shift, stride=1,
                         compute_dtype=jnp.bfloat16, approx_silu=True))
    assert out3.shape == (N, Cout, H, W), out3.shape
    assert jnp.allclose(out3, ref, atol=0.15, rtol=0.1), (
        float(jnp.max(jnp.abs(out3 - ref))))

    print("KERNEL_OK")
</pallas_src>

<mosaic_0001>
module attributes {stable_mosaic.version = 11 : i64} {
  func.func @_base_conv_kernel(%arg0: i32, %arg1: memref<1x18x18x128xf32, #tpu.memory_space<vmem>>, %arg2: memref<1152x128xf32, #tpu.memory_space<vmem>>, %arg3: memref<1x128xf32, #tpu.memory_space<vmem>>, %arg4: memref<1x128xf32, #tpu.memory_space<vmem>>, %arg5: memref<1x16x16x128xf32, #tpu.memory_space<vmem>>, %arg6: memref<256x1152xf32, #tpu.memory_space<vmem>>) attributes {dimension_semantics = [#tpu.dimension_semantics<parallel>], iteration_bounds = array<i64: 2>, scalar_prefetch = 0 : i64, scratch_operands = 1 : i64, tpu.core_type = #tpu.core_type<tc>, window_params = [{transform_indices = @transform_0, window_bounds = array<i64: 1, 18, 18, 128>}, {pipeline_mode = #tpu.pipeline_mode<synchronous>, transform_indices = @transform_1, window_bounds = array<i64: 1152, 128>}, {pipeline_mode = #tpu.pipeline_mode<synchronous>, transform_indices = @transform_2, window_bounds = array<i64: 1, 128>}, {pipeline_mode = #tpu.pipeline_mode<synchronous>, transform_indices = @transform_3, window_bounds = array<i64: 1, 128>}, {transform_indices = @transform_4, window_bounds = array<i64: 1, 16, 16, 128>}]} {
    %c0 = arith.constant 0 : index
    %c0_0 = arith.constant 0 : index
    %c0_1 = arith.constant 0 : index
    %c0_2 = arith.constant 0 : index
    %0 = vector.load %arg1[%c0, %c0_0, %c0_1, %c0_2] : memref<1x18x18x128xf32, #tpu.memory_space<vmem>>, vector<1x16x16x128xf32>
    %1 = vector.shape_cast %0 : vector<1x16x16x128xf32> to vector<16x16x128xf32>
    %2 = vector.shape_cast %1 : vector<16x16x128xf32> to vector<256x128xf32>
    %c0_3 = arith.constant 0 : index
    %c0_4 = arith.constant 0 : index
    %3 = vector.load %arg6[%c0_3, %c0_4] : memref<256x1152xf32, #tpu.memory_space<vmem>>, vector<256x128xf32>
    tpu.vector_store %arg6[%c0_3, %c0_4], %2 {strides = array<i32>} : memref<256x1152xf32, #tpu.memory_space<vmem>>, vector<256x128xf32>,
    %c0_5 = arith.constant 0 : index
    %c0_6 = arith.constant 0 : index
    %c1 = arith.constant 1 : index
    %c0_7 = arith.constant 0 : index
    %4 = vector.load %arg1[%c0_5, %c0_6, %c1, %c0_7] : memref<1x18x18x128xf32, #tpu.memory_space<vmem>>, vector<1x16x16x128xf32>
    %5 = vector.shape_cast %4 : vector<1x16x16x128xf32> to vector<16x16x128xf32>
    %6 = vector.shape_cast %5 : vector<16x16x128xf32> to vector<256x128xf32>
    %c0_8 = arith.constant 0 : index
    %c128 = arith.constant 128 : index
    %7 = vector.load %arg6[%c0_8, %c128] : memref<256x1152xf32, #tpu.memory_space<vmem>>, vector<256x128xf32>
    tpu.vector_store %arg6[%c0_8, %c128], %6 {strides = array<i32>} : memref<256x1152xf32, #tpu.memory_space<vmem>>, vector<256x128xf32>,
    %c0_9 = arith.constant 0 : index
    %c0_10 = arith.constant 0 : index
    %c2 = arith.constant 2 : index
    %c0_11 = arith.constant 0 : index
    %8 = vector.load %arg1[%c0_9, %c0_10, %c2, %c0_11] : memref<1x18x18x128xf32, #tpu.memory_space<vmem>>, vector<1x16x16x128xf32>
    %9 = vector.shape_cast %8 : vector<1x16x16x128xf32> to vector<16x16x128xf32>
    %10 = vector.shape_cast %9 : vector<16x16x128xf32> to vector<256x128xf32>
    %c0_12 = arith.constant 0 : index
    %c256 = arith.constant 256 : index
    %11 = vector.load %arg6[%c0_12, %c256] : memref<256x1152xf32, #tpu.memory_space<vmem>>, vector<256x128xf32>
    tpu.vector_store %arg6[%c0_12, %c256], %10 {strides = array<i32>} : memref<256x1152xf32, #tpu.memory_space<vmem>>, vector<256x128xf32>,
    %c0_13 = arith.constant 0 : index
    %c1_14 = arith.constant 1 : index
    %c0_15 = arith.constant 0 : index
    %c0_16 = arith.constant 0 : index
    %12 = vector.load %arg1[%c0_13, %c1_14, %c0_15, %c0_16] : memref<1x18x18x128xf32, #tpu.memory_space<vmem>>, vector<1x16x16x128xf32>
    %13 = vector.shape_cast %12 : vector<1x16x16x128xf32> to vector<16x16x128xf32>
    %14 = vector.shape_cast %13 : vector<16x16x128xf32> to vector<256x128xf32>
    %c0_17 = arith.constant 0 : index
    %c384 = arith.constant 384 : index
    %15 = vector.load %arg6[%c0_17, %c384] : memref<256x1152xf32, #tpu.memory_space<vmem>>, vector<256x128xf32>
    tpu.vector_store %arg6[%c0_17, %c384], %14 {strides = array<i32>} : memref<256x1152xf32, #tpu.memory_space<vmem>>, vector<256x128xf32>,
    %c0_18 = arith.constant 0 : index
    %c1_19 = arith.constant 1 : index
    %c1_20 = arith.constant 1 : index
    %c0_21 = arith.constant 0 : index
    %16 = vector.load %arg1[%c0_18, %c1_19, %c1_20, %c0_21] : memref<1x18x18x128xf32, #tpu.memory_space<vmem>>, vector<1x16x16x128xf32>
    %17 = vector.shape_cast %16 : vector<1x16x16x128xf32> to vector<16x16x128xf32>
    %18 = vector.shape_cast %17 : vector<16x16x128xf32> to vector<256x128xf32>
    %c0_22 = arith.constant 0 : index
    %c512 = arith.constant 512 : index
    %19 = vector.load %arg6[%c0_22, %c512] : memref<256x1152xf32, #tpu.memory_space<vmem>>, vector<256x128xf32>
    tpu.vector_store %arg6[%c0_22, %c512], %18 {strides = array<i32>} : memref<256x1152xf32, #tpu.memory_space<vmem>>, vector<256x128xf32>,
    %c0_23 = arith.constant 0 : index
    %c1_24 = arith.constant 1 : index
    %c2_25 = arith.constant 2 : index
    %c0_26 = arith.constant 0 : index
    %20 = vector.load %arg1[%c0_23, %c1_24, %c2_25, %c0_26] : memref<1x18x18x128xf32, #tpu.memory_space<vmem>>, vector<1x16x16x128xf32>
    %21 = vector.shape_cast %20 : vector<1x16x16x128xf32> to vector<16x16x128xf32>
    %22 = vector.shape_cast %21 : vector<16x16x128xf32> to vector<256x128xf32>
    %c0_27 = arith.constant 0 : index
    %c640 = arith.constant 640 : index
    %23 = vector.load %arg6[%c0_27, %c640] : memref<256x1152xf32, #tpu.memory_space<vmem>>, vector<256x128xf32>
    tpu.vector_store %arg6[%c0_27, %c640], %22 {strides = array<i32>} : memref<256x1152xf32, #tpu.memory_space<vmem>>, vector<256x128xf32>,
    %c0_28 = arith.constant 0 : index
    %c2_29 = arith.constant 2 : index
    %c0_30 = arith.constant 0 : index
    %c0_31 = arith.constant 0 : index
    %24 = vector.load %arg1[%c0_28, %c2_29, %c0_30, %c0_31] : memref<1x18x18x128xf32, #tpu.memory_space<vmem>>, vector<1x16x16x128xf32>
    %25 = vector.shape_cast %24 : vector<1x16x16x128xf32> to vector<16x16x128xf32>
    %26 = vector.shape_cast %25 : vector<16x16x128xf32> to vector<256x128xf32>
    %c0_32 = arith.constant 0 : index
    %c768 = arith.constant 768 : index
    %27 = vector.load %arg6[%c0_32, %c768] : memref<256x1152xf32, #tpu.memory_space<vmem>>, vector<256x128xf32>
    tpu.vector_store %arg6[%c0_32, %c768], %26 {strides = array<i32>} : memref<256x1152xf32, #tpu.memory_space<vmem>>, vector<256x128xf32>,
    %c0_33 = arith.constant 0 : index
    %c2_34 = arith.constant 2 : index
    %c1_35 = arith.constant 1 : index
    %c0_36 = arith.constant 0 : index
    %28 = vector.load %arg1[%c0_33, %c2_34, %c1_35, %c0_36] : memref<1x18x18x128xf32, #tpu.memory_space<vmem>>, vector<1x16x16x128xf32>
    %29 = vector.shape_cast %28 : vector<1x16x16x128xf32> to vector<16x16x128xf32>
    %30 = vector.shape_cast %29 : vector<16x16x128xf32> to vector<256x128xf32>
    %c0_37 = arith.constant 0 : index
    %c896 = arith.constant 896 : index
    %31 = vector.load %arg6[%c0_37, %c896] : memref<256x1152xf32, #tpu.memory_space<vmem>>, vector<256x128xf32>
    tpu.vector_store %arg6[%c0_37, %c896], %30 {strides = array<i32>} : memref<256x1152xf32, #tpu.memory_space<vmem>>, vector<256x128xf32>,
    %c0_38 = arith.constant 0 : index
    %c2_39 = arith.constant 2 : index
    %c2_40 = arith.constant 2 : index
    %c0_41 = arith.constant 0 : index
    %32 = vector.load %arg1[%c0_38, %c2_39, %c2_40, %c0_41] : memref<1x18x18x128xf32, #tpu.memory_space<vmem>>, vector<1x16x16x128xf32>
    %33 = vector.shape_cast %32 : vector<1x16x16x128xf32> to vector<16x16x128xf32>
    %34 = vector.shape_cast %33 : vector<16x16x128xf32> to vector<256x128xf32>
    %c0_42 = arith.constant 0 : index
    %c1024 = arith.constant 1024 : index
    %35 = vector.load %arg6[%c0_42, %c1024] : memref<256x1152xf32, #tpu.memory_space<vmem>>, vector<256x128xf32>
    tpu.vector_store %arg6[%c0_42, %c1024], %34 {strides = array<i32>} : memref<256x1152xf32, #tpu.memory_space<vmem>>, vector<256x128xf32>,
    %c0_43 = arith.constant 0 : index
    %c0_44 = arith.constant 0 : index
    %36 = vector.load %arg6[%c0_43, %c0_44] : memref<256x1152xf32, #tpu.memory_space<vmem>>, vector<256x1152xf32>
    %c0_45 = arith.constant 0 : index
    %c0_46 = arith.constant 0 : index
    %37 = vector.load %arg2[%c0_45, %c0_46] : memref<1152x128xf32, #tpu.memory_space<vmem>>, vector<1152x128xf32>
    %cst = arith.constant dense<0.000000e+00> : vector<256x128xf32>
    %38 = tpu.matmul %36, %37, %cst {dimension_numbers = #tpu.dot_dimension_numbers<[1], [0], [0], [1], [0, 0, 1, 1], [], []>} : vector<256x1152xf32>, vector<1152x128xf32>, vector<256x128xf32> -> vector<256x128xf32>
    %c0_47 = arith.constant 0 : index
    %c0_48 = arith.constant 0 : index
    %39 = vector.load %arg3[%c0_47, %c0_48] : memref<1x128xf32, #tpu.memory_space<vmem>>, vector<1x128xf32>
    %40 = vector.broadcast %39 : vector<1x128xf32> to vector<256x128xf32>
    %41 = arith.mulf %38, %40 : vector<256x128xf32>
    %c0_49 = arith.constant 0 : index
    %c0_50 = arith.constant 0 : index
    %42 = vector.load %arg4[%c0_49, %c0_50] : memref<1x128xf32, #tpu.memory_space<vmem>>, vector<1x128xf32>
    %43 = vector.broadcast %42 : vector<1x128xf32> to vector<256x128xf32>
    %44 = arith.addf %41, %43 : vector<256x128xf32>
    %45 = arith.negf %44 : vector<256x128xf32>
    %46 = math.exp %45 : vector<256x128xf32>
    %cst_51 = arith.constant 1.000000e+00 : f32
    %47 = vector.broadcast %cst_51 : f32 to vector<256x128xf32>
    %48 = arith.addf %47, %46 : vector<256x128xf32>
    %49 = arith.divf %47, %48 : vector<256x128xf32>
    %50 = arith.mulf %44, %49 : vector<256x128xf32>
    %51 = vector.shape_cast %50 : vector<256x128xf32> to vector<16x16x128xf32>
    %c0_52 = arith.constant 0 : index
    %c0_53 = arith.constant 0 : index
    %c0_54 = arith.constant 0 : index
    %c0_55 = arith.constant 0 : index
    %52 = vector.load %arg5[%c0_52, %c0_53, %c0_54, %c0_55] : memref<1x16x16x128xf32, #tpu.memory_space<vmem>>, vector<1x16x16x128xf32>
    %53 = vector.shape_cast %52 : vector<1x16x16x128xf32> to vector<16x16x128xf32>
    %54 = vector.shape_cast %51 : vector<16x16x128xf32> to vector<1x16x16x128xf32>
    tpu.vector_store %arg5[%c0_52, %c0_53, %c0_54, %c0_55], %54 {strides = array<i32>} : memref<1x16x16x128xf32, #tpu.memory_space<vmem>>, vector<1x16x16x128xf32>,
    return
  }
  func.func @transform_0(%arg0: i32) -> (i32, i32, i32, i32) {
    %c0_i32 = arith.constant 0 : i32
    %c0_i32_0 = arith.constant 0 : i32
    %c0_i32_1 = arith.constant 0 : i32
    %c0_i32_2 = arith.constant 0 : i32
    return %arg0, %c0_i32, %c0_i32_0, %c0_i32_1 : i32, i32, i32, i32
  }
  func.func @transform_1(%arg0: i32) -> (i32, i32) {
    %c0_i32 = arith.constant 0 : i32
    %c0_i32_0 = arith.constant 0 : i32
    %c0_i32_1 = arith.constant 0 : i32
    return %c0_i32, %c0_i32_0 : i32, i32
  }
  func.func @transform_2(%arg0: i32) -> (i32, i32) {
    %c0_i32 = arith.constant 0 : i32
    %c0_i32_0 = arith.constant 0 : i32
    %c0_i32_1 = arith.constant 0 : i32
    return %c0_i32, %c0_i32_0 : i32, i32
  }
  func.func @transform_3(%arg0: i32) -> (i32, i32) {
    %c0_i32 = arith.constant 0 : i32
    %c0_i32_0 = arith.constant 0 : i32
    %c0_i32_1 = arith.constant 0 : i32
    return %c0_i32, %c0_i32_0 : i32, i32
  }
  func.func @transform_4(%arg0: i32) -> (i32, i32, i32, i32) {
    %c0_i32 = arith.constant 0 : i32
    %c0_i32_0 = arith.constant 0 : i32
    %c0_i32_1 = arith.constant 0 : i32
    %c0_i32_2 = arith.constant 0 : i32
    return %arg0, %c0_i32, %c0_i32_0, %c0_i32_1 : i32, i32, i32, i32
  }
}

</mosaic_0001>

<bundles_post_ra>
// kernel: base_conv_pallas.1
= control target key start
LH: loop header
LB: loop body
LE: loop exit
PB: predicated region body
PF: predicated region fallthrough
CT: control target
= control target key end

     0   :  { %s3651_s15 = smov 0   ;;  %s5259_s0 = inlined_call_operand.vmem [shape: f32[2,18,18,128], index: 0, kind: input, shape index: {}]   ;;  %s5260_s1 = inlined_call_operand.vmem [shape: f32[1152,128], index: 1, kind: input, shape index: {}]   ;;  %s5261_s2 = inlined_call_operand.vmem [shape: f32[1,128], index: 2, kind: input, shape index: {}]   ;;  %s5262_s3 = inlined_call_operand.vmem [shape: f32[1,128], index: 3, kind: input, shape index: {}]   ;;  %s5263_s4 = inlined_call_operand.vmem [shape: f32[2,16,16,128], index: 4, kind: output, shape index: {}]  }
   0x1 LB: > { %s2722_s16 = sadd.s32 4294967295, %s3623_s15   ;;  %p2726_p0 = scmp.ge.s32.totalorder %s3623_s15, 1  ;;  %s3623_s15 = sphi %s3651_s15, %s14_s15  }
   0x2   : > { %p162_p1 = scmp.lt.s32.totalorder %s3623_s15, 3 }
   0x4   : > { %p163_p2 = pnand %p2726_p0, %p162_p1 }
   0x6   : > { %166 = sbr.rel (%p163_p2) target bundleno = 630 (0x276), region = 36 }
   0xd   : > { %v1064_v0 = vld [vmem:[%s5260_s1] sm:$0xff]  ;;  %v1065_v1 = vld [vmem:[%s5260_s1 + $0x8] sm:$0xff]  ;;  %v5264_v3 = vmov 0.0|0.0   ;;  %v1066_v6 = vld [vmem:[%s5260_s1 + $0x10] sm:$0xff]  ;;  %p188_p3 = scmp.lt.s32.totalorder %s2722_s16, 1 }
   0xe   : > { %v1096_v2 = vld [vmem:[%s5260_s1 + $0x100] sm:$0xff]  ;;  %3087 = vmatprep.subr.bf16.mxu1 %v5264_v3  ;;  %3135 = vmatprep.subr.bf16.mxu0 %v5264_v3  ;;  %v3088_v4 = vpack.c.bf16 %v1065_v1, %v1064_v0  ;;  %v1097_v5 = vld [vmem:[%s5260_s1 + $0x108] sm:$0xff]  ;;  %v1067_v7 = vld [vmem:[%s5260_s1 + $0x18] sm:$0xff] }
   0xf   : > { %v3136_v8 = vpack.c.bf16 %v1097_v5, %v1096_v2  ;;  %v1098_v9 = vld [vmem:[%s5260_s1 + $0x110] sm:$0xff]  ;;  %v1099_v10 = vld [vmem:[%s5260_s1 + $0x118] sm:$0xff]  ;;  %v3091_v11 = vpack.c.bf16 %v1067_v7, %v1066_v6  ;;  %v1068_v13 = vld [vmem:[%s5260_s1 + $0x20] sm:$0xff]  ;;  %s5407_s16 = smov (!%p188_p3, %s2722_s16), 1 }
  0x10   : > { %3089 = vmatpush1.bf16.msra.mxu1 %v3088_v4  ;;  %v3139_v12 = vpack.c.bf16 %v1099_v10, %v1098_v9  ;;  %v1069_v14 = vld [vmem:[%s5260_s1 + $0x28] sm:$0xff]  ;;  %v1100_v15 = vld [vmem:[%s5260_s1 + $0x120] sm:$0xff]  ;;  %v1070_v19 = vld [vmem:[%s5260_s1 + $0x30] sm:$0xff]  ;;  %s3479_s7 = smul.u32 432, %s5407_s16  ;;  %s2958_s8 = sshll.u32 %s5407_s16, 8 }
  0x11   : > { %3137 = vmatpush1.bf16.msra.mxu0 %v3136_v8  ;;  %3090 = vmatprep.subr.bf16.mxu1 %v5264_v3  ;;  %v1101_v16 = vld [vmem:[%s5260_s1 + $0x128] sm:$0xff]  ;;  %v3094_v17 = vpack.c.bf16 %v1069_v14, %v1068_v13  ;;  %v1071_v20 = vld [vmem:[%s5260_s1 + $0x38] sm:$0xff]  ;;  %v1102_v21 = vld [vmem:[%s5260_s1 + $0x130] sm:$0xff]  ;;  %s5062_s10 = scalar_lea.vmem %s5263_s4, %s2958_s8 }
  0x12   : > { %3138 = vmatprep.subr.bf16.mxu0 %v5264_v3  ;;  %v3142_v18 = vpack.c.bf16 %v1101_v16, %v1100_v15  ;;  %v1103_v22 = vld [vmem:[%s5260_s1 + $0x138] sm:$0xff]  ;;  %v3097_v23 = vpack.c.bf16 %v1071_v20, %v1070_v19  ;;  %v1072_v25 = vld [vmem:[%s5260_s1 + $0x40] sm:$0xff]  ;;  %v1073_v26 = vld [vmem:[%s5260_s1 + $0x48] sm:$0xff]  ;;  %s3751_s20 = scalar_lea.vmem %s5259_s0, %s3479_s7 }
  0x13   : > { %v3145_v24 = vpack.c.bf16 %v1103_v22, %v1102_v21  ;;  %v1104_v27 = vld [vmem:[%s5260_s1 + $0x140] sm:$0xff]  ;;  %v1105_v28 = vld [vmem:[%s5260_s1 + $0x148] sm:$0xff]  ;;  %v3100_v29 = vpack.c.bf16 %v1073_v26, %v1072_v25  ;;  %v1074_v31 = vld [vmem:[%s5260_s1 + $0x50] sm:$0xff] }
  0x14   : > { %3092 = vmatpush1.bf16.msra.mxu1 %v3091_v11  ;;  %v3148_v30 = vpack.c.bf16 %v1105_v28, %v1104_v27  ;;  %v1075_v32 = vld [vmem:[%s5260_s1 + $0x58] sm:$0xff]  ;;  %v1106_v33 = vld [vmem:[%s5260_s1 + $0x150] sm:$0xff]  ;;  %v1076_v37 = vld [vmem:[%s5260_s1 + $0x60] sm:$0xff] }
  0x15   : > { %3140 = vmatpush1.bf16.msra.mxu0 %v3139_v12  ;;  %3093 = vmatprep.subr.bf16.mxu1 %v5264_v3  ;;  %v1107_v34 = vld [vmem:[%s5260_s1 + $0x158] sm:$0xff]  ;;  %v3103_v35 = vpack.c.bf16 %v1075_v32, %v1074_v31  ;;  %v1077_v38 = vld [vmem:[%s5260_s1 + $0x68] sm:$0xff]  ;;  %v1108_v39 = vld [vmem:[%s5260_s1 + $0x160] sm:$0xff] }
  0x16   : > { %3141 = vmatprep.subr.bf16.mxu0 %v5264_v3  ;;  %v3151_v36 = vpack.c.bf16 %v1107_v34, %v1106_v33  ;;  %v1109_v40 = vld [vmem:[%s5260_s1 + $0x168] sm:$0xff]  ;;  %v3769_v42 = vld [vmem:[%s3751_s20 + $0x18] sm:$0xff]  ;;  %v3106_v43 = vpack.c.bf16 %v1077_v38, %v1076_v37  ;;  %v1078_v45 = vld [vmem:[%s5260_s1 + $0x70] sm:$0xff] }
  0x17   : > { %v262_v41 = vld [vmem:[%s3751_s20 + $0x1] sm:$0xff]  ;;  %1497 = vmatprep.mubr.f32.mxu0 %v3769_v42  ;;  %v3154_v44 = vpack.c.bf16 %v1109_v40, %v1108_v39  ;;  %v1079_v46 = vld [vmem:[%s5260_s1 + $0x78] sm:$0xff]  ;;  %v1110_v47 = vld [vmem:[%s5260_s1 + $0x170] sm:$0xff] }
  0x18   : > { %3095 = vmatpush1.bf16.msra.mxu1 %v3094_v17  ;;  %1272 = vmatprep.mubr.f32.mxu1 %v262_v41  ;;  %v1111_v48 = vld [vmem:[%s5260_s1 + $0x178] sm:$0xff]  ;;  %v3109_v49 = vpack.c.bf16 %v1079_v46, %v1078_v45  ;;  %v1080_v51 = vld [vmem:[%s5260_s1 + $0x80] sm:$0xff]  ;;  %v1081_v52 = vld [vmem:[%s5260_s1 + $0x88] sm:$0xff] }
  0x19   : > { %3143 = vmatpush1.bf16.msra.mxu0 %v3142_v18  ;;  %3096 = vmatprep.subr.bf16.mxu1 %v5264_v3  ;;  %v3157_v50 = vpack.c.bf16 %v1111_v48, %v1110_v47  ;;  %v1112_v53 = vld [vmem:[%s5260_s1 + $0x180] sm:$0xff]  ;;  %v1113_v54 = vld [vmem:[%s5260_s1 + $0x188] sm:$0xff]  ;;  %v3112_v55 = vpack.c.bf16 %v1081_v52, %v1080_v51  ;;  %v1082_v57 = vld [vmem:[%s5260_s1 + $0x90] sm:$0xff] }
  0x1a   : > { %3144 = vmatprep.subr.bf16.mxu0 %v5264_v3  ;;  %v3160_v56 = vpack.c.bf16 %v1113_v54, %v1112_v53  ;;  %v1083_v58 = vld [vmem:[%s5260_s1 + $0x98] sm:$0xff]  ;;  %v1114_v59 = vld [vmem:[%s5260_s1 + $0x190] sm:$0xff]  ;;  %v1084_v63 = vld [vmem:[%s5260_s1 + $0xa0] sm:$0xff] }
  0x1b   : > { %v1115_v60 = vld [vmem:[%s5260_s1 + $0x198] sm:$0xff]  ;;  %v3115_v61 = vpack.c.bf16 %v1083_v58, %v1082_v57  ;;  %v1085_v0 = vld [vmem:[%s5260_s1 + $0xa8] sm:$0xff]  ;;  %v1116_v1 = vld [vmem:[%s5260_s1 + $0x1a0] sm:$0xff] }
  0x1c   : > { %3098 = vmatpush1.bf16.msra.mxu1 %v3097_v23  ;;  %v3163_v62 = vpack.c.bf16 %v1115_v60, %v1114_v59  ;;  %v1117_v2 = vld [vmem:[%s5260_s1 + $0x1a8] sm:$0xff]  ;;  %v3118_v4 = vpack.c.bf16 %v1085_v0, %v1084_v63  ;;  %v1086_v6 = vld [vmem:[%s5260_s1 + $0xb0] sm:$0xff]  ;;  %v1087_v7 = vld [vmem:[%s5260_s1 + $0xb8] sm:$0xff] }
  0x1d   : > { %3146 = vmatpush1.bf16.msra.mxu0 %v3145_v24  ;;  %3099 = vmatprep.subr.bf16.mxu1 %v5264_v3  ;;  %v3166_v5 = vpack.c.bf16 %v1117_v2, %v1116_v1  ;;  %v1118_v8 = vld [vmem:[%s5260_s1 + $0x1b0] sm:$0xff]  ;;  %v1119_v9 = vld [vmem:[%s5260_s1 + $0x1b8] sm:$0xff]  ;;  %v3121_v10 = vpack.c.bf16 %v1087_v7, %v1086_v6  ;;  %v1088_v12 = vld [vmem:[%s5260_s1 + $0xc0] sm:$0xff] }
  0x1e   : > { %3147 = vmatprep.subr.bf16.mxu0 %v5264_v3  ;;  %v3169_v11 = vpack.c.bf16 %v1119_v9, %v1118_v8  ;;  %v1089_v13 = vld [vmem:[%s5260_s1 + $0xc8] sm:$0xff]  ;;  %v1120_v14 = vld [vmem:[%s5260_s1 + $0x1c0] sm:$0xff]  ;;  %v1090_v18 = vld [vmem:[%s5260_s1 + $0xd0] sm:$0xff] }
  0x1f   : > { %v1121_v15 = vld [vmem:[%s5260_s1 + $0x1c8] sm:$0xff]  ;;  %v3124_v16 = vpack.c.bf16 %v1089_v13, %v1088_v12  ;;  %v1091_v19 = vld [vmem:[%s5260_s1 + $0xd8] sm:$0xff]  ;;  %v1122_v20 = vld [vmem:[%s5260_s1 + $0x1d0] sm:$0xff] }
  0x20   : > { %3101 = vmatpush1.bf16.msra.mxu1 %v3100_v29  ;;  %v3172_v17 = vpack.c.bf16 %v1121_v15, %v1120_v14  ;;  %v1123_v21 = vld [vmem:[%s5260_s1 + $0x1d8] sm:$0xff]  ;;  %v3127_v22 = vpack.c.bf16 %v1091_v19, %v1090_v18  ;;  %v1092_v24 = vld [vmem:[%s5260_s1 + $0xe0] sm:$0xff]  ;;  %v1093_v25 = vld [vmem:[%s5260_s1 + $0xe8] sm:$0xff] }
  0x21   : > { %3149 = vmatpush1.bf16.msra.mxu0 %v3148_v30  ;;  %3102 = vmatprep.subr.bf16.mxu1 %v5264_v3  ;;  %v3175_v23 = vpack.c.bf16 %v1123_v21, %v1122_v20  ;;  %v1124_v26 = vld [vmem:[%s5260_s1 + $0x1e0] sm:$0xff]  ;;  %v1125_v27 = vld [vmem:[%s5260_s1 + $0x1e8] sm:$0xff]  ;;  %v3130_v28 = vpack.c.bf16 %v1093_v25, %v1092_v24  ;;  %v1094_v30 = vld [vmem:[%s5260_s1 + $0xf0] sm:$0xff] }
  0x22   : > { %3150 = vmatprep.subr.bf16.mxu0 %v5264_v3  ;;  %v3178_v29 = vpack.c.bf16 %v1125_v27, %v1124_v26  ;;  %v1095_v31 = vld [vmem:[%s5260_s1 + $0xf8] sm:$0xff]  ;;  %v1126_v32 = vld [vmem:[%s5260_s1 + $0x1f0] sm:$0xff]  ;;  %v1161_v37 = vld [vmem:[%s5260_s1 + $0x308] sm:$0xff] }
  0x23   : > { %v1127_v33 = vld [vmem:[%s5260_s1 + $0x1f8] sm:$0xff]  ;;  %v3133_v34 = vpack.c.bf16 %v1095_v31, %v1094_v30  ;;  %v1128_v38 = vld [vmem:[%s5260_s1 + $0x200] sm:$0xff]  ;;  %v1129_v39 = vld [vmem:[%s5260_s1 + $0x208] sm:$0xff] }
  0x24   : > { %3104 = vmatpush1.bf16.msra.mxu1 %v3103_v35  ;;  %v3181_v35 = vpack.c.bf16 %v1127_v33, %v1126_v32  ;;  %v198_v40 = vld [vmem:[%s3751_s20] sm:$0xff]  ;;  %v263_v45 = vld [vmem:[%s3751_s20 + $0x9] sm:$0xff]  ;;  %v1131_v47 = vld [vmem:[%s5260_s1 + $0x218] sm:$0xff] }
  0x25   : > { %3152 = vmatpush1.bf16.msra.mxu0 %v3151_v36  ;;  %3105 = vmatprep.subr.bf16.mxu1 %v5264_v3  ;;  %v1160_v36 = vld [vmem:[%s5260_s1 + $0x300] sm:$0xff]  ;;  %v1130_v46 = vld [vmem:[%s5260_s1 + $0x210] sm:$0xff]  ;;  %v199_v51 = vld [vmem:[%s3751_s20 + $0x8] sm:$0xff] }
  0x26   : > { %3153 = vmatprep.subr.bf16.mxu0 %v5264_v3  ;;  %v3913_v41 = vpack.c.bf16 %v1161_v37, %v1160_v36  ;;  %v2731_v48 = vld [vmem:[%s3751_s20 + $0x20] sm:$0xff]  ;;  %v327_v52 = vld [vmem:[%s3751_s20 + $0xa] sm:$0xff]  ;;  %v3187_v54 = vpack.c.bf16 %v1131_v47, %v1130_v46  ;;  %v2733_v0 = vld [vmem:[%s3751_s20 + $0x38] sm:$0xff] }
  0x27   : > { %v3936_v53 = vld [vmem:[%s3751_s20 + $0x19] sm:$0xff]  ;;  %v1133_v58 = vld [vmem:[%s5260_s1 + $0x228] sm:$0xff]  ;;  %v1134_v2 = vld [vmem:[%s5260_s1 + $0x230] sm:$0xff] }
  0x28   : > { %3107 = vmatpush1.bf16.msra.mxu1 %v3106_v43  ;;  %v326_v43 = vld [vmem:[%s3751_s20 + $0x2] sm:$0xff]  ;;  %v1167_v6 = vld [vmem:[%s5260_s1 + $0x338] sm:$0xff]  ;;  %v2735_v18 = vld [vmem:[%s3751_s20 + $0x50] sm:$0xff] }
  0x29   : > { %3155 = vmatpush1.bf16.msra.mxu0 %v3154_v44  ;;  %3108 = vmatprep.subr.bf16.mxu1 %v5264_v3  ;;  %v3184_v44 = vpack.c.bf16 %v1129_v39, %v1128_v38  ;;  %v1132_v57 = vld [vmem:[%s5260_s1 + $0x220] sm:$0xff]  ;;  %v1165_v60 = vld [vmem:[%s5260_s1 + $0x328] sm:$0xff]  ;;  %v3987_v8 = vld [vmem:[%s3751_s20 + $0x31] sm:$0xff] }
  0x2a   : > { %3156 = vmatprep.subr.bf16.mxu0 %v5264_v3  ;;  %v1164_v59 = vld [vmem:[%s5260_s1 + $0x320] sm:$0xff]  ;;  %v3190_v63 = vpack.c.bf16 %v1133_v58, %v1132_v57  ;;  %v2734_v9 = vld [vmem:[%s3751_s20 + $0x48] sm:$0xff]  ;;  %v4010_v15 = vld [vmem:[%s3751_s20 + $0x32] sm:$0xff] }
  0x2b   : > { %v3965_v1 = vpack.c.bf16 %v1165_v60, %v1164_v59  ;;  %v3984_v7 = vld [vmem:[%s3751_s20 + $0x22] sm:$0xff]  ;;  %v1138_v20 = vld [vmem:[%s5260_s1 + $0x250] sm:$0xff]  ;;  %v1139_v21 = vld [vmem:[%s5260_s1 + $0x258] sm:$0xff] }
  0x2c   : > { %3110 = vmatpush1.bf16.msra.mxu1 %v3109_v49  ;;  %v1162_v49 = vld [vmem:[%s5260_s1 + $0x310] sm:$0xff]  ;;  %v1137_v12 = vld [vmem:[%s5260_s1 + $0x248] sm:$0xff]  ;;  %v1168_v13 = vld [vmem:[%s5260_s1 + $0x340] sm:$0xff]  ;;  %v3199_v26 = vpack.c.bf16 %v1139_v21, %v1138_v20 }
  0x2d   : > { %3158 = vmatpush1.bf16.msra.mxu0 %v3157_v50  ;;  %3111 = vmatprep.subr.bf16.mxu1 %v5264_v3  ;;  %v1163_v50 = vld [vmem:[%s5260_s1 + $0x318] sm:$0xff]  ;;  %v1169_v14 = vld [vmem:[%s5260_s1 + $0x348] sm:$0xff]  ;;  %v2736_v27 = vld [vmem:[%s3751_s20 + $0x60] sm:$0xff] }
  0x2e   : > { %3159 = vmatprep.subr.bf16.mxu0 %v5264_v3  ;;  %v4018_v19 = vpack.c.bf16 %v1169_v14, %v1168_v13  ;;  %v4036_v24 = vld [vmem:[%s3751_s20 + $0x3a] sm:$0xff]  ;;  %v4039_v25 = vld [vmem:[%s3751_s20 + $0x49] sm:$0xff] }
  0x2f   : > { %v1141_v30 = vld [vmem:[%s5260_s1 + $0x268] sm:$0xff]  ;;  %v1172_v31 = vld [vmem:[%s5260_s1 + $0x360] sm:$0xff]  ;;  %v1142_v38 = vld [vmem:[%s5260_s1 + $0x270] sm:$0xff] }
  0x30   : > { %3113 = vmatpush1.bf16.msra.mxu1 %v3112_v55  ;;  %v2732_v55 = vld [vmem:[%s3751_s20 + $0x30] sm:$0xff]  ;;  %v1173_v32 = vld [vmem:[%s5260_s1 + $0x368] sm:$0xff]  ;;  %v1143_v39 = vld [vmem:[%s5260_s1 + $0x278] sm:$0xff] }
  0x31   : > { %3161 = vmatpush1.bf16.msra.mxu0 %v3160_v56  ;;  %3114 = vmatprep.subr.bf16.mxu1 %v5264_v3  ;;  %v3940_v56 = vpack.c.bf16 %v1163_v50, %v1162_v49  ;;  %v4062_v33 = vld [vmem:[%s3751_s20 + $0x4a] sm:$0xff]  ;;  %v4070_v37 = vpack.c.bf16 %v1173_v32, %v1172_v31  ;;  %v3205_v46 = vpack.c.bf16 %v1143_v39, %v1142_v38  ;;  %v2738_v47 = vld [vmem:[%s3751_s20 + $0x78] sm:$0xff]  ;;  %v1144_v49 = vld [vmem:[%s5260_s1 + $0x280] sm:$0xff] }
  0x32   : > { %3162 = vmatprep.subr.bf16.mxu0 %v5264_v3  ;;  %v2737_v36 = vld [vmem:[%s3751_s20 + $0x68] sm:$0xff]  ;;  %v2739_v58 = vld [vmem:[%s3751_s20 + $0x80] sm:$0xff]  ;;  %v1146_v60 = vld [vmem:[%s5260_s1 + $0x290] sm:$0xff] }
  0x33   : > { %v1145_v50 = vld [vmem:[%s5260_s1 + $0x288] sm:$0xff]  ;;  %v1180_v13 = vld [vmem:[%s5260_s1 + $0x3a0] sm:$0xff]  ;;  %v4175_v21 = vld [vmem:[%s3751_s20 + $0x98] sm:$0xff] }
  0x34   : > { %3116 = vmatpush1.bf16.msra.mxu1 %v3115_v61  ;;  %v3957_v61 = vld [vmem:[%s3751_s20 + $0x1a] sm:$0xff]  ;;  %v3208_v57 = vpack.c.bf16 %v1145_v50, %v1144_v49  ;;  %v1181_v14 = vld [vmem:[%s5260_s1 + $0x3a8] sm:$0xff]  ;;  %v4201_v31 = vld [vmem:[%s3751_s20 + $0x91] sm:$0xff] }
  0x35   : > { %3164 = vmatpush1.bf16.msra.mxu0 %v3163_v62  ;;  %3117 = vmatprep.subr.bf16.mxu1 %v5264_v3  ;;  %v3960_v62 = vld [vmem:[%s3751_s20 + $0x21] sm:$0xff]  ;;  %v4233_v50 = vld [vmem:[%s3751_s20 + $0xb0] sm:$0xff] }
  0x36   : > { %3165 = vmatprep.subr.bf16.mxu0 %v5264_v3  ;;  %v1152_v38 = vld [vmem:[%s5260_s1 + $0x2c0] sm:$0xff]  ;;  %v1153_v39 = vld [vmem:[%s5260_s1 + $0x2c8] sm:$0xff] }
  0x37   : > { %v3220_v49 = vpack.c.bf16 %v1153_v39, %v1152_v38  ;;  %v1158_v38 = vld [vmem:[%s5260_s1 + $0x2f0] sm:$0xff]  ;;  %v1159_v39 = vld [vmem:[%s5260_s1 + $0x2f8] sm:$0xff] }
  0x38   : > { %3119 = vmatpush1.bf16.msra.mxu1 %v3118_v4  ;;  %v1135_v4 = vld [vmem:[%s5260_s1 + $0x238] sm:$0xff] }
  0x39   : > { %3167 = vmatpush1.bf16.msra.mxu0 %v3166_v5  ;;  %3120 = vmatprep.subr.bf16.mxu1 %v5264_v3  ;;  %v1166_v5 = vld [vmem:[%s5260_s1 + $0x330] sm:$0xff] }
  0x3a   : > { %3168 = vmatprep.subr.bf16.mxu0 %v5264_v3 }
  0x3c   : > { %3122 = vmatpush1.bf16.msra.mxu1 %v3121_v10  ;;  %v3992_v10 = vpack.c.bf16 %v1167_v6, %v1166_v5  ;;  %v4143_v5 = vld [vmem:[%s3751_s20 + $0x79] sm:$0xff] }
  0x3d   : > { %3170 = vmatpush1.bf16.msra.mxu0 %v3169_v11  ;;  %3123 = vmatprep.subr.bf16.mxu1 %v5264_v3  ;;  %v1136_v11 = vld [vmem:[%s5260_s1 + $0x240] sm:$0xff] }
  0x3e   : > { %3171 = vmatprep.subr.bf16.mxu0 %v5264_v3 }
  0x40   : > { %3125 = vmatpush1.bf16.msra.mxu1 %v3124_v16  ;;  %v4013_v16 = vld [vmem:[%s3751_s20 + $0x39] sm:$0xff] }
  0x41   : > { %3173 = vmatpush1.bf16.msra.mxu0 %v3172_v17  ;;  %3126 = vmatprep.subr.bf16.mxu1 %v5264_v3  ;;  %v3196_v17 = vpack.c.bf16 %v1137_v12, %v1136_v11  ;;  %v1148_v11 = vld [vmem:[%s5260_s1 + $0x2a0] sm:$0xff]  ;;  %v1149_v12 = vld [vmem:[%s5260_s1 + $0x2a8] sm:$0xff] }
  0x42   : > { %3174 = vmatprep.subr.bf16.mxu0 %v5264_v3  ;;  %v3214_v20 = vpack.c.bf16 %v1149_v12, %v1148_v11  ;;  %v1156_v12 = vld [vmem:[%s5260_s1 + $0x2e0] sm:$0xff] }
  0x44   : > { %3128 = vmatpush1.bf16.msra.mxu1 %v3127_v22  ;;  %v1170_v22 = vld [vmem:[%s5260_s1 + $0x350] sm:$0xff] }
  0x45   : > { %3176 = vmatpush1.bf16.msra.mxu0 %v3175_v23  ;;  %3129 = vmatprep.subr.bf16.mxu1 %v5264_v3  ;;  %v1171_v23 = vld [vmem:[%s5260_s1 + $0x358] sm:$0xff] }
  0x46   : > { %3177 = vmatprep.subr.bf16.mxu0 %v5264_v3 }
  0x48   : > { %3131 = vmatpush1.bf16.msra.mxu1 %v3130_v28  ;;  %v4044_v28 = vpack.c.bf16 %v1171_v23, %v1170_v22  ;;  %v4179_v22 = vpack.c.bf16 %v1181_v14, %v1180_v13  ;;  %v1150_v23 = vld [vmem:[%s5260_s1 + $0x2b0] sm:$0xff]  ;;  %v1157_v13 = vld [vmem:[%s5260_s1 + $0x2e8] sm:$0xff]  ;;  %v1188_v14 = vld [vmem:[%s5260_s1 + $0x3e0] sm:$0xff] }
  0x49   : > { %3179 = vmatpush1.bf16.msra.mxu0 %v3178_v29  ;;  %3132 = vmatprep.subr.bf16.mxu1 %v5264_v3  ;;  %v1140_v29 = vld [vmem:[%s5260_s1 + $0x260] sm:$0xff] }
  0x4a   : > { %3180 = vmatprep.subr.bf16.mxu0 %v5264_v3  ;;  %5325 = vst [vmem:[#allocation3_spill] sm:$0xff] %v4179_v22 }
  0x4c   : > { %3134 = vmatpush1.bf16.msra.mxu1 %v3133_v34  ;;  %v4065_v34 = vld [vmem:[%s3751_s20 + $0x51] sm:$0xff] }
  0x4d   : > { %3182 = vmatpush1.bf16.msra.mxu0 %v3181_v35  ;;  %3311 = vmatprep.subr.bf16.mxu1 %v5264_v3  ;;  %v3202_v35 = vpack.c.bf16 %v1141_v30, %v1140_v29  ;;  %v1183_v29 = vld [vmem:[%s5260_s1 + $0x3b8] sm:$0xff]  ;;  %v4198_v30 = vld [vmem:[%s3751_s20 + $0x82] sm:$0xff] }
  0x4e   : > { %3183 = vmatprep.subr.bf16.mxu0 %v5264_v3 }
  0x4f   : > { %1273 = vmatmul.mubr.f32.vlgmr.msra.gmra.mrb[0].mxu1 %v198_v40  ;;  %v1174_v40 = vld [vmem:[%s5260_s1 + $0x370] sm:$0xff] }
  0x50   : > { %1498 = vmatmul.mubr.f32.vlgmr.msra.gmra.mrb[0].mxu0 %v326_v43  ;;  %3327 = vmatpush1.bf16.msra.mxu1 %v3913_v41  ;;  %v1175_v43 = vld [vmem:[%s5260_s1 + $0x378] sm:$0xff] }
  0x51   : > { %3185 = vmatpush1.bf16.msra.mxu0 %v3184_v44  ;;  %1277 = vmatprep.mubr.f32.mxu1 %v263_v45  ;;  %v4088_v44 = vld [vmem:[%s3751_s20 + $0x52] sm:$0xff]  ;;  %v4091_v45 = vld [vmem:[%s3751_s20 + $0x61] sm:$0xff] }
  0x52   : > { %1502 = vmatprep.mubr.f32.mxu0 %v2731_v48  ;;  %3186 = vmatprep.subr.bf16.mxu0 %v5264_v3 }
  0x53   : > { %1278 = vmatmul.mubr.f32.gmra.mrb[2].mxu1 %v199_v51  ;;  %3312 = vmatprep.subr.bf16.mxu1 %v5264_v3  ;;  %v1176_v51 = vld [vmem:[%s5260_s1 + $0x380] sm:$0xff] }
  0x54   : > { %1503 = vmatmul.mubr.f32.gmra.mrb[2].mxu0 %v327_v52  ;;  %1282 = vmatprep.mubr.f32.mxu1 %v3936_v53  ;;  %v1177_v52 = vld [vmem:[%s5260_s1 + $0x388] sm:$0xff] }
  0x55   : > { %1507 = vmatprep.mubr.f32.mxu0 %v2732_v55  ;;  %3188 = vmatpush1.bf16.msra.mxu0 %v3187_v54  ;;  %v4114_v54 = vld [vmem:[%s3751_s20 + $0x62] sm:$0xff]  ;;  %v4122_v59 = vpack.c.bf16 %v1177_v52, %v1176_v51  ;;  %v1154_v52 = vld [vmem:[%s5260_s1 + $0x2d0] sm:$0xff] }
  0x56   : > { %3328 = vmatpush1.bf16.msra.mxu1 %v3940_v56  ;;  %3189 = vmatprep.subr.bf16.mxu0 %v5264_v3 }
  0x57   : > { %1283 = vmatmul.mubr.f32.gmra.mrb[4].mxu1 %v3769_v42  ;;  %3313 = vmatprep.subr.bf16.mxu1 %v5264_v3  ;;  %v3193_v42 = vpack.c.bf16 %v1135_v4, %v1134_v2  ;;  %v1179_v2 = vld [vmem:[%s5260_s1 + $0x398] sm:$0xff]  ;;  %v4140_v4 = vld [vmem:[%s3751_s20 + $0x6a] sm:$0xff] }
  0x58   : > { %1508 = vmatmul.mubr.f32.gmra.mrb[4].mxu0 %v3957_v61  ;;  %1287 = vmatprep.mubr.f32.mxu1 %v3960_v62 }
  0x59   : > { %1512 = vmatprep.mubr.f32.mxu0 %v2733_v0  ;;  %3191 = vmatpush1.bf16.msra.mxu0 %v3190_v63  ;;  %v1147_v63 = vld [vmem:[%s5260_s1 + $0x298] sm:$0xff] }
  0x5a   : > { %3329 = vmatpush1.bf16.msra.mxu1 %v3965_v1  ;;  %3192 = vmatprep.subr.bf16.mxu0 %v5264_v3  ;;  %v3211_v6 = vpack.c.bf16 %v1147_v63, %v1146_v60  ;;  %v1187_v60 = vld [vmem:[%s5260_s1 + $0x3d8] sm:$0xff] }
  0x5b   : > { %1288 = vmatmul.mubr.f32.gmra.mrb[6].mxu1 %v2731_v48  ;;  %3314 = vmatprep.subr.bf16.mxu1 %v5264_v3  ;;  %v4096_v48 = vpack.c.bf16 %v1175_v43, %v1174_v40  ;;  %v1184_v40 = vld [vmem:[%s5260_s1 + $0x3c0] sm:$0xff]  ;;  %v1185_v43 = vld [vmem:[%s5260_s1 + $0x3c8] sm:$0xff] }
  0x5c   : > { %1513 = vmatmul.mubr.f32.gmra.mrb[6].mxu0 %v3984_v7  ;;  %1292 = vmatprep.mubr.f32.mxu1 %v3987_v8  ;;  %v4237_v51 = vpack.c.bf16 %v1185_v43, %v1184_v40  ;;  %v4257_v63 = vld [vmem:[%s3751_s20 + $0x9a] sm:$0xff]  ;;  %v1190_v40 = vld [vmem:[%s5260_s1 + $0x3f0] sm:$0xff] }
  0x5d   : > { %1517 = vmatprep.mubr.f32.mxu0 %v2734_v9  ;;  %3194 = vmatpush1.bf16.msra.mxu0 %v3193_v42  ;;  %v4146_v42 = vld [vmem:[%s3751_s20 + $0x90] sm:$0xff]  ;;  %5328 = vst [vmem:[#allocation6_spill] sm:$0xff] %v4257_v63  ;;  %v1191_v43 = vld [vmem:[%s5260_s1 + $0x3f8] sm:$0xff] }
  0x5e   : > { %3330 = vmatpush1.bf16.msra.mxu1 %v3992_v10  ;;  %3195 = vmatprep.subr.bf16.mxu0 %v5264_v3  ;;  %5327 = vst [vmem:[#allocation5_spill] sm:$0xff] %v4237_v51 }
  0x5f   : > { %1293 = vmatmul.mubr.f32.gmra.mrb[8].mxu1 %v2732_v55  ;;  %3315 = vmatprep.subr.bf16.mxu1 %v5264_v3  ;;  %v4117_v55 = vld [vmem:[%s3751_s20 + $0x69] sm:$0xff] }
  0x60   : > { %1518 = vmatmul.mubr.f32.gmra.mrb[8].mxu0 %v4010_v15  ;;  %1297 = vmatprep.mubr.f32.mxu1 %v4013_v16 }
  0x61   : > { %1522 = vmatprep.mubr.f32.mxu0 %v2735_v18  ;;  %3197 = vmatpush1.bf16.msra.mxu0 %v3196_v17  ;;  %v4169_v17 = vld [vmem:[%s3751_s20 + $0x7a] sm:$0xff] }
  0x62   : > { %3331 = vmatpush1.bf16.msra.mxu1 %v4018_v19  ;;  %3198 = vmatprep.subr.bf16.mxu0 %v5264_v3 }
  0x63   : > { %1298 = vmatmul.mubr.f32.gmra.mrb[10].mxu1 %v2733_v0  ;;  %3316 = vmatprep.subr.bf16.mxu1 %v5264_v3  ;;  %v1178_v0 = vld [vmem:[%s5260_s1 + $0x390] sm:$0xff] }
  0x64   : > { %1523 = vmatmul.mubr.f32.gmra.mrb[10].mxu0 %v4036_v24  ;;  %1302 = vmatprep.mubr.f32.mxu1 %v4039_v25 }
  0x65   : > { %1527 = vmatprep.mubr.f32.mxu0 %v2736_v27  ;;  %3200 = vmatpush1.bf16.msra.mxu0 %v3199_v26  ;;  %v1151_v26 = vld [vmem:[%s5260_s1 + $0x2b8] sm:$0xff] }
  0x66   : > { %3332 = vmatpush1.bf16.msra.mxu1 %v4044_v28  ;;  %3201 = vmatprep.subr.bf16.mxu0 %v5264_v3  ;;  %v3217_v32 = vpack.c.bf16 %v1151_v26, %v1150_v23  ;;  %v4287_v23 = vld [vmem:[%s3751_s20 + $0xaa] sm:$0xff] }
  0x67   : > { %1303 = vmatmul.mubr.f32.gmra.mrb[12].mxu1 %v2734_v9  ;;  %3317 = vmatprep.subr.bf16.mxu1 %v5264_v3  ;;  %v4150_v9 = vpack.c.bf16 %v1179_v2, %v1178_v0  ;;  %v4260_v0 = vld [vmem:[%s3751_s20 + $0xa9] sm:$0xff]  ;;  %5330 = vst [vmem:[#allocation8_spill] sm:$0xff] %v4287_v23  ;;  %v4290_v26 = vld [vmem:[%s3751_s20 + $0xb1] sm:$0xff] }
  0x68   : > { %1528 = vmatmul.mubr.f32.gmra.mrb[12].mxu0 %v4062_v33  ;;  %1307 = vmatprep.mubr.f32.mxu1 %v4065_v34 }
  0x69   : > { %1532 = vmatprep.mubr.f32.mxu0 %v2737_v36  ;;  %3203 = vmatpush1.bf16.msra.mxu0 %v3202_v35  ;;  %v4204_v35 = vld [vmem:[%s3751_s20 + $0xa8] sm:$0xff] }
  0x6a   : > { %3333 = vmatpush1.bf16.msra.mxu1 %v4070_v37  ;;  %3204 = vmatprep.subr.bf16.mxu0 %v5264_v3 }
  0x6b   : > { %1308 = vmatmul.mubr.f32.gmra.mrb[14].mxu1 %v2735_v18  ;;  %3318 = vmatprep.subr.bf16.mxu1 %v5264_v3  ;;  %v4172_v18 = vld [vmem:[%s3751_s20 + $0x81] sm:$0xff] }
  0x6c   : > { %1533 = vmatmul.mubr.f32.gmra.mrb[14].mxu0 %v4088_v44  ;;  %1312 = vmatprep.mubr.f32.mxu1 %v4091_v45 }
  0x6d   : > { %1537 = vmatprep.mubr.f32.mxu0 %v2738_v47  ;;  %3206 = vmatpush1.bf16.msra.mxu0 %v3205_v46  ;;  %v4227_v46 = vld [vmem:[%s3751_s20 + $0x92] sm:$0xff] }
  0x6e   : > { %3334 = vmatpush1.bf16.msra.mxu1 %v4096_v48  ;;  %3207 = vmatprep.subr.bf16.mxu0 %v5264_v3 }
  0x6f   : > { %1313 = vmatmul.mubr.f32.gmra.mrb[16].mxu1 %v2736_v27  ;;  %3319 = vmatprep.subr.bf16.mxu1 %v5264_v3  ;;  %v1182_v27 = vld [vmem:[%s5260_s1 + $0x3b0] sm:$0xff] }
  0x70   : > { %1538 = vmatmul.mubr.f32.gmra.mrb[16].mxu0 %v4114_v54  ;;  %1317 = vmatprep.mubr.f32.mxu1 %v4117_v55 }
  0x71   : > { %1542 = vmatprep.mubr.f32.mxu0 %v2739_v58  ;;  %3209 = vmatpush1.bf16.msra.mxu0 %v3208_v57  ;;  %v1155_v57 = vld [vmem:[%s5260_s1 + $0x2d8] sm:$0xff] }
  0x72   : > { %3335 = vmatpush1.bf16.msra.mxu1 %v4122_v59  ;;  %3210 = vmatprep.subr.bf16.mxu0 %v5264_v3  ;;  %v3223_v2 = vpack.c.bf16 %v1155_v57, %v1154_v52  ;;  %v1193_v52 = vld [vmem:[%s5260_s1 + $0x408] sm:$0xff]  ;;  %v4323_v57 = vld [vmem:[%s3751_s20 + $0xb2] sm:$0xff] }
  0x73   : > { %1318 = vmatmul.mubr.f32.gmra.mrb[18].mxu1 %v2737_v36  ;;  %3320 = vmatprep.subr.bf16.mxu1 %v5264_v3  ;;  %v4208_v36 = vpack.c.bf16 %v1183_v29, %v1182_v27  ;;  %v3226_v27 = vpack.c.bf16 %v1157_v13, %v1156_v12  ;;  %v4293_v29 = vld [vmem:[%s3751_s20 + $0xc8] sm:$0xff]  ;;  %5332 = vst [vmem:[#allocation10_spill] sm:$0xff] %v4323_v57 }
  0x74   : > { %1543 = vmatmul.mubr.f32.gmra.mrb[18].mxu0 %v4140_v4  ;;  %1322 = vmatprep.mubr.f32.mxu1 %v4143_v5  ;;  %v4333_v12 = vpack.c.bf16 %v1191_v43, %v1190_v40  ;;  %v4365_v40 = vld [vmem:[%s3751_s20 + $0xf0] sm:$0xff]  ;;  %v4372_v43 = vld [vmem:[%s3751_s20 + $0xda] sm:$0xff] }
  0x75   : > { %1547 = vmatprep.mubr.f32.mxu0 %v4146_v42  ;;  %3212 = vmatpush1.bf16.msra.mxu0 %v3211_v6  ;;  %5326 = vst [vmem:[#allocation4_spill] sm:$0xff] %v4208_v36  ;;  %v4263_v6 = vld [vmem:[%s3751_s20 + $0xc0] sm:$0xff]  ;;  %5336 = vst [vmem:[#allocation14_spill] sm:$0xff] %v4372_v43 }
  0x76   : > { %3336 = vmatpush1.bf16.msra.mxu1 %v4150_v9  ;;  %3213 = vmatprep.subr.bf16.mxu0 %v5264_v3  ;;  %5333 = vst [vmem:[#allocation11_spill] sm:$0xff] %v4333_v12 }
  0x77   : > { %1323 = vmatmul.mubr.f32.gmra.mrb[20].mxu1 %v2738_v47  ;;  %3321 = vmatprep.subr.bf16.mxu1 %v5264_v3  ;;  %v4230_v47 = vld [vmem:[%s3751_s20 + $0x99] sm:$0xff] }
  0x78   : > { %1548 = vmatmul.mubr.f32.gmra.mrb[20].mxu0 %v4169_v17  ;;  %1327 = vmatprep.mubr.f32.mxu1 %v4172_v18 }
  0x79   : > { %1552 = vmatprep.mubr.f32.mxu0 %v4175_v21  ;;  %3215 = vmatpush1.bf16.msra.mxu0 %v3214_v20  ;;  %v1189_v20 = vld [vmem:[%s5260_s1 + $0x3e8] sm:$0xff] }
  0x7a   : > { %3337 = vmatpush1.bf16.msra.mxu1 %v4179_v22  ;;  %3216 = vmatprep.subr.bf16.mxu0 %v5264_v3  ;;  %v4453_v22 = vld [vmem:[%s3751_s20 + $0x129] sm:$0xff] }
  0x7b   : > { %1328 = vmatmul.mubr.f32.gmra.mrb[22].mxu1 %v2739_v58  ;;  %3322 = vmatprep.subr.bf16.mxu1 %v5264_v3  ;;  %v1186_v58 = vld [vmem:[%s5260_s1 + $0x3d0] sm:$0xff]  ;;  %5348 = vst [vmem:[#allocation26_spill] sm:$0xff] %v4453_v22 }
  0x7c   : > { %1553 = vmatmul.mubr.f32.gmra.mrb[22].mxu0 %v4198_v30  ;;  %1332 = vmatprep.mubr.f32.mxu1 %v4201_v31  ;;  %v4267_v11 = vpack.c.bf16 %v1187_v60, %v1186_v58  ;;  %v4326_v58 = vld [vmem:[%s3751_s20 + $0xc1] sm:$0xff]  ;;  %v3229_v60 = vpack.c.bf16 %v1159_v39, %v1158_v38  ;;  %v4359_v38 = vld [vmem:[%s3751_s20 + $0xca] sm:$0xff]  ;;  %v4362_v39 = vld [vmem:[%s3751_s20 + $0xd9] sm:$0xff] }
  0x7d   : > { %1557 = vmatprep.mubr.f32.mxu0 %v4204_v35  ;;  %3218 = vmatpush1.bf16.msra.mxu0 %v3217_v32  ;;  %v4297_v32 = vpack.c.bf16 %v1189_v20, %v1188_v14  ;;  %v4343_v14 = vld [vmem:[%s3751_s20 + $0xc2] sm:$0xff]  ;;  %5335 = vst [vmem:[#allocation13_spill] sm:$0xff] %v4359_v38 }
  0x7e   : > { %3338 = vmatpush1.bf16.msra.mxu1 %v4208_v36  ;;  %3219 = vmatprep.subr.bf16.mxu0 %v5264_v3  ;;  %5329 = vst [vmem:[#allocation7_spill] sm:$0xff] %v4267_v11  ;;  %5334 = vst [vmem:[#allocation12_spill] sm:$0xff] %v4343_v14  ;;  %v4346_v20 = vld [vmem:[%s3751_s20 + $0xc9] sm:$0xff]  ;;  %v4440_v36 = vld [vmem:[%s3751_s20 + $0x121] sm:$0xff] }
  0x7f   : > { %1333 = vmatmul.mubr.f32.gmra.mrb[24].mxu1 %v4146_v42  ;;  %3323 = vmatprep.subr.bf16.mxu1 %v5264_v3  ;;  %5331 = vst [vmem:[#allocation9_spill] sm:$0xff] %v4297_v32  ;;  %5345 = vst [vmem:[#allocation23_spill] sm:$0xff] %v4440_v36 }
  0x80   : > { %1558 = vmatmul.mubr.f32.gmra.mrb[24].mxu0 %v4227_v46  ;;  %1337 = vmatprep.mubr.f32.mxu1 %v4230_v47 }
  0x81   : > { %1562 = vmatprep.mubr.f32.mxu0 %v4233_v50  ;;  %3221 = vmatpush1.bf16.msra.mxu0 %v3220_v49  ;;  %v1192_v49 = vld [vmem:[%s5260_s1 + $0x400] sm:$0xff] }
  0x82   : > { %3339 = vmatpush1.bf16.msra.mxu1 %v4237_v51  ;;  %3222 = vmatprep.subr.bf16.mxu0 %v5264_v3  ;;  %v4337_v13 = vpack.c.bf16 %v1193_v52, %v1192_v49  ;;  %v4375_v49 = vld [vmem:[%s3751_s20 + $0xe1] sm:$0xff]  ;;  %v4378_v52 = vld [vmem:[%s3751_s20 + $0xf8] sm:$0xff] }
  0x83   : > { %1338 = vmatmul.mubr.f32.gmra.mrb[26].mxu1 %v4175_v21  ;;  %3324 = vmatprep.subr.bf16.mxu1 %v5264_v3  ;;  %v4427_v51 = vld [vmem:[%s3751_s20 + $0x111] sm:$0xff] }
  0x84   : > { %1563 = vmatmul.mubr.f32.gmra.mrb[26].mxu0 %v4257_v63  ;;  %1342 = vmatprep.mubr.f32.mxu1 %v4260_v0  ;;  %v4456_v63 = vld [vmem:[%s3751_s20 + $0x140] sm:$0xff] }
  0x85   : > { %1567 = vmatprep.mubr.f32.mxu0 %v4263_v6  ;;  %3224 = vmatpush1.bf16.msra.mxu0 %v3223_v2  ;;  %v4329_v2 = vld [vmem:[%s3751_s20 + $0xd8] sm:$0xff]  ;;  %5349 = vst [vmem:[#allocation27_spill] sm:$0xff] %v4456_v63 }
  0x86   : > { %3340 = vmatpush1.bf16.msra.mxu1 %v4267_v11  ;;  %3225 = vmatprep.subr.bf16.mxu0 %v5264_v3  ;;  %v4414_v11 = vld [vmem:[%s3751_s20 + $0x109] sm:$0xff] }
  0x87   : > { %1343 = vmatmul.mubr.f32.gmra.mrb[28].mxu1 %v4204_v35  ;;  %3325 = vmatprep.subr.bf16.mxu1 %v5264_v3 }
  0x88   : > { %1568 = vmatmul.mubr.f32.gmra.mrb[28].mxu0 %v4287_v23  ;;  %1347 = vmatprep.mubr.f32.mxu1 %v4290_v26  ;;  %v4443_v23 = vld [vmem:[%s3751_s20 + $0x138] sm:$0xff] }
  0x89   : > { %1572 = vmatprep.mubr.f32.mxu0 %v4293_v29  ;;  %3227 = vmatpush1.bf16.msra.mxu0 %v3226_v27  ;;  %v4349_v27 = vld [vmem:[%s3751_s20 + $0xe0] sm:$0xff]  ;;  %5346 = vst [vmem:[#allocation24_spill] sm:$0xff] %v4443_v23 }
  0x8a   : > { %3341 = vmatpush1.bf16.msra.mxu1 %v4297_v32  ;;  %3228 = vmatprep.subr.bf16.mxu0 %v5264_v3  ;;  %v4401_v32 = vld [vmem:[%s3751_s20 + $0xf9] sm:$0xff] }
  0x8b   : > { %1348 = vmatmul.mubr.f32.gmra.mrb[30].mxu1 %v4233_v50  ;;  %3326 = vmatprep.subr.bf16.mxu1 %v5264_v3 }
  0x8c   : > { %1573 = vmatmul.mubr.f32.gmra.mrb[30].mxu0 %v4323_v57  ;;  %1352 = vmatprep.mubr.f32.mxu1 %v4326_v58  ;;  %v4430_v57 = vld [vmem:[%s3751_s20 + $0x128] sm:$0xff] }
  0x8d   : > { %1577 = vmatprep.mubr.f32.mxu0 %v4329_v2  ;;  %3230 = vmatpush1.bf16.msra.mxu0 %v3229_v60  ;;  %v4385_v60 = vld [vmem:[%s3751_s20 + $0xe2] sm:$0xff]  ;;  %5343 = vst [vmem:[#allocation21_spill] sm:$0xff] %v4430_v57 }
  0x8e   : > { %3342 = vmatpush1.bf16.msra.mxu1 %v4333_v12  ;;  %3231 = vmatprep.subr.bf16.mxu0 %v5264_v3  ;;  %5337 = vst [vmem:[#allocation15_spill] sm:$0xff] %v4385_v60  ;;  %v4388_v3 = vld [vmem:[%s3751_s20 + $0xf1] sm:$0xff]  ;;  %v4391_v12 = vld [vmem:[%s3751_s20 + $0x108] sm:$0xff] }
  0x8f   : > { %1353 = vmatmul.mubr.f32.gmra.mrb[32].mxu1 %v4263_v6  ;;  %3280 = vmatprep.subr.bf16.mxu1 %v4337_v13 }
  0x90   : > { %1578 = vmatmul.mubr.f32.gmra.mrb[32].mxu0 %v4343_v14  ;;  %1357 = vmatprep.mubr.f32.mxu1 %v4346_v20  ;;  %v4417_v14 = vld [vmem:[%s3751_s20 + $0x120] sm:$0xff] }
  0x91   : > { %1582 = vmatprep.mubr.f32.mxu0 %v4349_v27  ;;  %5341 = vst [vmem:[#allocation19_spill] sm:$0xff] %v4417_v14 }
  0x93   : > { %1358 = vmatmul.mubr.f32.gmra.mrb[34].mxu1 %v4293_v29 }
  0x94   : > { %1583 = vmatmul.mubr.f32.gmra.mrb[34].mxu0 %v4359_v38  ;;  %1362 = vmatprep.mubr.f32.mxu1 %v4362_v39  ;;  %v4404_v38 = vld [vmem:[%s3751_s20 + $0x110] sm:$0xff] }
  0x95   : > { %1587 = vmatprep.mubr.f32.mxu0 %v4365_v40  ;;  %5339 = vst [vmem:[#allocation17_spill] sm:$0xff] %v4404_v38 }
  0x97   : > { %1363 = vmatmul.mubr.f32.gmra.mrb[36].mxu1 %v4329_v2 }
  0x98   : > { %1588 = vmatmul.mubr.f32.gmra.mrb[36].mxu0 %v4372_v43  ;;  %1367 = vmatprep.mubr.f32.mxu1 %v4375_v49  ;;  %v4398_v43 = vld [vmem:[%s3751_s20 + $0xf2] sm:$0xff] }
  0x99   : > { %1592 = vmatprep.mubr.f32.mxu0 %v4378_v52  ;;  %5338 = vst [vmem:[#allocation16_spill] sm:$0xff] %v4398_v43 }
  0x9b   : > { %1368 = vmatmul.mubr.f32.gmra.mrb[38].mxu1 %v4349_v27 }
  0x9c   : > { %1593 = vmatmul.mubr.f32.gmra.mrb[38].mxu0 %v4385_v60  ;;  %1372 = vmatprep.mubr.f32.mxu1 %v4388_v3  ;;  %v4411_v60 = vld [vmem:[%s3751_s20 + $0xfa] sm:$0xff] }
  0x9d   : > { %1597 = vmatprep.mubr.f32.mxu0 %v4391_v12  ;;  %5340 = vst [vmem:[#allocation18_spill] sm:$0xff] %v4411_v60 }
  0x9f   : > { %1373 = vmatmul.mubr.f32.gmra.mrb[40].mxu1 %v4365_v40 }
  0xa0   : > { %1598 = vmatmul.mubr.f32.gmra.mrb[40].mxu0 %v4398_v43  ;;  %1377 = vmatprep.mubr.f32.mxu1 %v4401_v32  ;;  %v4424_v43 = vld [vmem:[%s3751_s20 + $0x10a] sm:$0xff] }
  0xa1   : > { %1602 = vmatprep.mubr.f32.mxu0 %v4404_v38  ;;  %5342 = vst [vmem:[#allocation20_spill] sm:$0xff] %v4424_v43 }
  0xa3   : > { %1378 = vmatmul.mubr.f32.gmra.mrb[42].mxu1 %v4378_v52 }
  0xa4   : > { %1603 = vmatmul.mubr.f32.gmra.mrb[42].mxu0 %v4411_v60  ;;  %1382 = vmatprep.mubr.f32.mxu1 %v4414_v11  ;;  %v4437_v60 = vld [vmem:[%s3751_s20 + $0x112] sm:$0xff] }
  0xa5   : > { %1607 = vmatprep.mubr.f32.mxu0 %v4417_v14  ;;  %5344 = vst [vmem:[#allocation22_spill] sm:$0xff] %v4437_v60 }
  0xa7   : > { %1383 = vmatmul.mubr.f32.gmra.mrb[44].mxu1 %v4391_v12 }
  0xa8   : > { %1608 = vmatmul.mubr.f32.gmra.mrb[44].mxu0 %v4424_v43  ;;  %1387 = vmatprep.mubr.f32.mxu1 %v4427_v51  ;;  %v4450_v43 = vld [vmem:[%s3751_s20 + $0x122] sm:$0xff] }
  0xa9   : > { %1612 = vmatprep.mubr.f32.mxu0 %v4430_v57  ;;  %5347 = vst [vmem:[#allocation25_spill] sm:$0xff] %v4450_v43 }
  0xab   : > { %1388 = vmatmul.mubr.f32.gmra.mrb[46].mxu1 %v4404_v38  ;;  %v4469_v38 = vld [vmem:[%s3751_s20 + $0x150] sm:$0xff] }
  0xac   : > { %1613 = vmatmul.mubr.f32.gmra.mrb[46].mxu0 %v4437_v60  ;;  %1392 = vmatprep.mubr.f32.mxu1 %v4440_v36  ;;  %v4463_v60 = vld [vmem:[%s3751_s20 + $0x12a] sm:$0xff]  ;;  %v4466_v36 = vld [vmem:[%s3751_s20 + $0x139] sm:$0xff]  ;;  %5352 = vst [vmem:[#allocation30_spill] sm:$0xff] %v4469_v38 }
  0xad   : > { %1617 = vmatprep.mubr.f32.mxu0 %v4443_v23  ;;  %5350 = vst [vmem:[#allocation28_spill] sm:$0xff] %v4463_v60  ;;  %5351 = vst [vmem:[#allocation29_spill] sm:$0xff] %v4466_v36 }
  0xaf   : > { %1393 = vmatmul.mubr.f32.gmra.mrb[48].mxu1 %v4417_v14  ;;  %v4482_v14 = vld [vmem:[%s3751_s20 + $0x158] sm:$0xff] }
  0xb0   : > { %1618 = vmatmul.mubr.f32.gmra.mrb[48].mxu0 %v4450_v43  ;;  %1397 = vmatprep.mubr.f32.mxu1 %v4453_v22  ;;  %v4476_v43 = vld [vmem:[%s3751_s20 + $0x13a] sm:$0xff]  ;;  %5355 = vst [vmem:[#allocation33_spill] sm:$0xff] %v4482_v14 }
  0xb1   : > { %1622 = vmatprep.mubr.f32.mxu0 %v4456_v63  ;;  %5353 = vst [vmem:[#allocation31_spill] sm:$0xff] %v4476_v43  ;;  %v4479_v22 = vld [vmem:[%s3751_s20 + $0x141] sm:$0xff] }
  0xb2   : > { %5354 = vst [vmem:[#allocation32_spill] sm:$0xff] %v4479_v22 }
  0xb3   : > { %1398 = vmatmul.mubr.f32.gmra.mrb[50].mxu1 %v4430_v57  ;;  %v4495_v57 = vld [vmem:[%s3751_s20 + $0x168] sm:$0xff] }
  0xb4   : > { %1623 = vmatmul.mubr.f32.gmra.mrb[50].mxu0 %v4463_v60  ;;  %1402 = vmatprep.mubr.f32.mxu1 %v4466_v36  ;;  %v4489_v60 = vld [vmem:[%s3751_s20 + $0x142] sm:$0xff]  ;;  %v4492_v36 = vld [vmem:[%s3751_s20 + $0x151] sm:$0xff] }
  0xb5   : > { %1627 = vmatprep.mubr.f32.mxu0 %v4469_v38  ;;  %5356 = vst [vmem:[#allocation34_spill] sm:$0xff] %v4489_v60  ;;  %5357 = vst [vmem:[#allocation35_spill] sm:$0xff] %v4492_v36 }
  0xb7   : > { %1403 = vmatmul.mubr.f32.gmra.mrb[52].mxu1 %v4443_v23  ;;  %v4508_v23 = vld [vmem:[%s3751_s20 + $0x170] sm:$0xff] }
  0xb8   : > { %1628 = vmatmul.mubr.f32.gmra.mrb[52].mxu0 %v4476_v43  ;;  %1407 = vmatprep.mubr.f32.mxu1 %v4479_v22  ;;  %v4502_v43 = vld [vmem:[%s3751_s20 + $0x152] sm:$0xff] }
  0xb9   : > { %1632 = vmatprep.mubr.f32.mxu0 %v4482_v14  ;;  %5358 = vst [vmem:[#allocation36_spill] sm:$0xff] %v4502_v43  ;;  %v4505_v22 = vld [vmem:[%s3751_s20 + $0x159] sm:$0xff] }
  0xba   : > { %5359 = vst [vmem:[#allocation37_spill] sm:$0xff] %v4505_v22 }
  0xbb   : > { %1408 = vmatmul.mubr.f32.gmra.mrb[54].mxu1 %v4456_v63  ;;  %v4521_v63 = vld [vmem:[%s3751_s20 + $0x180] sm:$0xff] }
  0xbc   : > { %1633 = vmatmul.mubr.f32.gmra.mrb[54].mxu0 %v4489_v60  ;;  %1412 = vmatprep.mubr.f32.mxu1 %v4492_v36  ;;  %v4515_v60 = vld [vmem:[%s3751_s20 + $0x15a] sm:$0xff]  ;;  %v4518_v36 = vld [vmem:[%s3751_s20 + $0x169] sm:$0xff]  ;;  %5361 = vst [vmem:[#allocation39_spill] sm:$0xff] %v4521_v63 }
  0xbd   : > { %1637 = vmatprep.mubr.f32.mxu0 %v4495_v57  ;;  %5360 = vst [vmem:[#allocation38_spill] sm:$0xff] %v4515_v60 }
  0xbf   : > { %1413 = vmatmul.mubr.f32.gmra.mrb[56].mxu1 %v4469_v38  ;;  %v4534_v38 = vld [vmem:[%s3751_s20 + $0x188] sm:$0xff] }
  0xc0   : > { %1638 = vmatmul.mubr.f32.gmra.mrb[56].mxu0 %v4502_v43  ;;  %1417 = vmatprep.mubr.f32.mxu1 %v4505_v22  ;;  %v4528_v43 = vld [vmem:[%s3751_s20 + $0x16a] sm:$0xff]  ;;  %5363 = vst [vmem:[#allocation41_spill] sm:$0xff] %v4534_v38 }
  0xc1   : > { %1642 = vmatprep.mubr.f32.mxu0 %v4508_v23  ;;  %5362 = vst [vmem:[#allocation40_spill] sm:$0xff] %v4528_v43  ;;  %v4531_v22 = vld [vmem:[%s3751_s20 + $0x171] sm:$0xff] }
  0xc3   : > { %1418 = vmatmul.mubr.f32.gmra.mrb[58].mxu1 %v4482_v14  ;;  %v4541_v14 = vld [vmem:[%s3751_s20 + $0x172] sm:$0xff] }
  0xc4   : > { %1643 = vmatmul.mubr.f32.gmra.mrb[58].mxu0 %v4515_v60  ;;  %1422 = vmatprep.mubr.f32.mxu1 %v4518_v36  ;;  %5364 = vst [vmem:[#allocation42_spill] sm:$0xff] %v4541_v14  ;;  %v1194_v60 = vld [vmem:[%s5260_s1 + $0x410] sm:$0xff] }
  0xc5   : > { %1647 = vmatprep.mubr.f32.mxu0 %v4521_v63  ;;  %v1197_v63 = vld [vmem:[%s5260_s1 + $0x428] sm:$0xff] }
  0xc7   : > { %1423 = vmatmul.mubr.f32.gmra.mrb[60].mxu1 %v4495_v57 }
  0xc8   : > { %1648 = vmatmul.mubr.f32.gmra.mrb[60].mxu0 %v4528_v43  ;;  %1427 = vmatprep.mubr.f32.mxu1 %v4531_v22  ;;  %v1195_v43 = vld [vmem:[%s5260_s1 + $0x418] sm:$0xff] }
  0xc9   : > { %1652 = vmatprep.mubr.f32.mxu0 %v4534_v38  ;;  %v3283_v38 = vpack.c.bf16 %v1195_v43, %v1194_v60  ;;  %v5399_v60 = vld [vmem:[#allocation28_spill] sm:$0xff] }
  0xcb   : > { %1428 = vmatmul.mubr.f32.gmra.mrb[62].mxu1 %v4508_v23 }
  0xcc   : > { %1653 = vmatmul.mubr.f32.gmra.mrb[62].mxu0 %v4541_v14  ;;  %1987 = vmatprep.mubr.f32.mxu1 %v4201_v31  ;;  %v1196_v14 = vld [vmem:[%s5260_s1 + $0x420] sm:$0xff] }
  0xcd   : > { %1722 = vmatprep.mubr.f32.mxu0 %v3957_v61  ;;  %v5365_v61 = vmov 0.0|0.0  }
  0xcf   : > { %1988 = vmatmul.mubr.f32.vlgmr.msra.gmra.mrb[64].mxu1 %v4146_v42  ;;  %v1198_v42 = vld [vmem:[%s5260_s1 + $0x430] sm:$0xff] }
  0xd0   : > { %1723 = vmatmul.mubr.f32.vlgmr.msra.gmra.mrb[0].mxu0 %v3936_v53  ;;  %3282 = vmatpush3.bf16.msra.mxu1 %v4337_v13  ;;  %v3287_v53 = vpack.c.bf16 %v1197_v63, %v1196_v14  ;;  %v5386_v63 = vld [vmem:[#allocation14_spill] sm:$0xff]  ;;  %v4698_v13 = vld [vmem:[%s3751_s20 + $0x181] sm:$0xff] }
  0xd1   : > { %3233 = vmatpush1.bf16.msra.mxu0 %v3913_v41  ;;  %1727 = vmatprep.mubr.f32.mxu0 %v3984_v7  ;;  %v1199_v41 = vld [vmem:[%s5260_s1 + $0x438] sm:$0xff]  ;;  %v1200_v7 = vld [vmem:[%s5260_s1 + $0x440] sm:$0xff]  ;;  %v5394_v14 = vld [vmem:[#allocation20_spill] sm:$0xff] }
  0xd2   : > { %1992 = vmatprep.mubr.f32.mxu1 %v4230_v47  ;;  %3234 = vmatprep.subr.bf16.mxu0 %v5365_v61 }
  0xd3   : > { %1993 = vmatmul.mubr.f32.gmra.mrb[66].mxu1 %v4175_v21  ;;  %3284 = vmatprep.subr.bf16.mxu1 %v3283_v38  ;;  %v5379_v21 = vld [vmem:[#allocation7_spill] sm:$0xff] }
  0xd4   : > { %1728 = vmatmul.mubr.f32.gmra.mrb[2].mxu0 %v3960_v62  ;;  %1997 = vmatprep.mubr.f32.mxu1 %v4260_v0  ;;  %v3291_v62 = vpack.c.bf16 %v1199_v41, %v1198_v42  ;;  %v2891_v42 = vld [vmem:[%s3751_s20 + $0x3a] sm:$0xff] }
  0xd5   : > { %1732 = vmatprep.mubr.f32.mxu0 %v4010_v15  ;;  %3236 = vmatpush1.bf16.msra.mxu0 %v3940_v56  ;;  %v1201_v15 = vld [vmem:[%s5260_s1 + $0x448] sm:$0xff]  ;;  %v5400_v41 = vld [vmem:[#allocation31_spill] sm:$0xff] }
  0xd6   : > { %3286 = vmatpush3.bf16.msra.mxu1 %v3283_v38  ;;  %3237 = vmatprep.subr.bf16.mxu0 %v5365_v61  ;;  %v3295_v56 = vpack.c.bf16 %v1201_v15, %v1200_v7 }
  0xd7   : > { %1998 = vmatmul.mubr.f32.gmra.mrb[68].mxu1 %v4204_v35  ;;  %3288 = vmatprep.subr.bf16.mxu1 %v3287_v53  ;;  %v5382_v35 = vld [vmem:[#allocation13_spill] sm:$0xff] }
  0xd8   : > { %1733 = vmatmul.mubr.f32.gmra.mrb[4].mxu0 %v3987_v8  ;;  %2002 = vmatprep.mubr.f32.mxu1 %v4290_v26  ;;  %v1202_v8 = vld [vmem:[%s5260_s1 + $0x450] sm:$0xff] }
  0xd9   : > { %1737 = vmatprep.mubr.f32.mxu0 %v4036_v24  ;;  %3239 = vmatpush1.bf16.msra.mxu0 %v3965_v1  ;;  %v1203_v24 = vld [vmem:[%s5260_s1 + $0x458] sm:$0xff] }
  0xda   : > { %3240 = vmatprep.subr.bf16.mxu0 %v5365_v61  ;;  %3290 = vmatpush3.bf16.msra.mxu1 %v3287_v53  ;;  %v3299_v1 = vpack.c.bf16 %v1203_v24, %v1202_v8  ;;  %v5401_v8 = vld [vmem:[#allocation34_spill] sm:$0xff]  ;;  %v2894_v24 = vld [vmem:[%s3751_s20 + $0x62] sm:$0xff] }
  0xdb   : > { %2003 = vmatmul.mubr.f32.gmra.mrb[70].mxu1 %v4233_v50  ;;  %3292 = vmatprep.subr.bf16.mxu1 %v3291_v62  ;;  %v5385_v50 = vld [vmem:[#allocation35_spill] sm:$0xff] }
  0xdc   : > { %1738 = vmatmul.mubr.f32.gmra.mrb[6].mxu0 %v4013_v16  ;;  %2007 = vmatprep.mubr.f32.mxu1 %v4326_v58  ;;  %v1204_v16 = vld [vmem:[%s5260_s1 + $0x460] sm:$0xff] }
  0xdd   : > { %1742 = vmatprep.mubr.f32.mxu0 %v4062_v33  ;;  %3242 = vmatpush1.bf16.msra.mxu0 %v3992_v10  ;;  %v1205_v33 = vld [vmem:[%s5260_s1 + $0x468] sm:$0xff] }
  0xde   : > { %3243 = vmatprep.subr.bf16.mxu0 %v5365_v61  ;;  %3294 = vmatpush3.bf16.msra.mxu1 %v3291_v62  ;;  %v3303_v10 = vpack.c.bf16 %v1205_v33, %v1204_v16  ;;  %v2892_v62 = vld [vmem:[%s3751_s20 + $0x4a] sm:$0xff] }
  0xdf   : > { %2008 = vmatmul.mubr.f32.gmra.mrb[72].mxu1 %v4263_v6  ;;  %3296 = vmatprep.subr.bf16.mxu1 %v3295_v56  ;;  %v5388_v6 = vld [vmem:[#allocation30_spill] sm:$0xff]  ;;  %v2895_v33 = vld [vmem:[%s3751_s20 + $0x6a] sm:$0xff] }
  0xe0   : > { %1743 = vmatmul.mubr.f32.gmra.mrb[8].mxu0 %v4039_v25  ;;  %2012 = vmatprep.mubr.f32.mxu1 %v4346_v20  ;;  %v1206_v25 = vld [vmem:[%s5260_s1 + $0x470] sm:$0xff] }
  0xe1   : > { %1747 = vmatprep.mubr.f32.mxu0 %v4088_v44  ;;  %3245 = vmatpush1.bf16.msra.mxu0 %v4018_v19  ;;  %v1207_v44 = vld [vmem:[%s5260_s1 + $0x478] sm:$0xff] }
  0xe2   : > { %3246 = vmatprep.subr.bf16.mxu0 %v5365_v61  ;;  %3298 = vmatpush3.bf16.msra.mxu1 %v3295_v56  ;;  %v3307_v19 = vpack.c.bf16 %v1207_v44, %v1206_v25  ;;  %v2893_v56 = vld [vmem:[%s3751_s20 + $0x52] sm:$0xff]  ;;  %v2896_v25 = vld [vmem:[%s3751_s20 + $0x7a] sm:$0xff] }
  0xe3   : > { %2013 = vmatmul.mubr.f32.gmra.mrb[74].mxu1 %v4293_v29  ;;  %3300 = vmatprep.subr.bf16.mxu1 %v3299_v1  ;;  %v5390_v29 = vld [vmem:[#allocation15_spill] sm:$0xff] }
  0xe4   : > { %1748 = vmatmul.mubr.f32.gmra.mrb[10].mxu0 %v4065_v34  ;;  %2017 = vmatprep.mubr.f32.mxu1 %v4362_v39  ;;  %v5367_v34 = vld [vmem:[#allocation3_spill] sm:$0xff] }
  0xe5   : > { %1752 = vmatprep.mubr.f32.mxu0 %v4114_v54  ;;  %3248 = vmatpush1.bf16.msra.mxu0 %v4044_v28  ;;  %v5366_v28 = vld [vmem:[#allocation6_spill] sm:$0xff]  ;;  %v5371_v54 = vld [vmem:[#allocation4_spill] sm:$0xff] }
  0xe6   : > { %3249 = vmatprep.subr.bf16.mxu0 %v5365_v61  ;;  %3302 = vmatpush3.bf16.msra.mxu1 %v3299_v1 }
  0xe7   : > { %2018 = vmatmul.mubr.f32.gmra.mrb[76].mxu1 %v4329_v2  ;;  %3304 = vmatprep.subr.bf16.mxu1 %v3303_v10  ;;  %v5392_v2 = vld [vmem:[#allocation16_spill] sm:$0xff] }
  0xe8   : > { %1753 = vmatmul.mubr.f32.gmra.mrb[12].mxu0 %v4091_v45  ;;  %2022 = vmatprep.mubr.f32.mxu1 %v4375_v49  ;;  %v5369_v45 = vld [vmem:[#allocation23_spill] sm:$0xff] }
  0xe9   : > { %1757 = vmatprep.mubr.f32.mxu0 %v4140_v4  ;;  %3251 = vmatpush1.bf16.msra.mxu0 %v4070_v37  ;;  %v5368_v37 = vld [vmem:[#allocation17_spill] sm:$0xff]  ;;  %v5374_v4 = vld [vmem:[#allocation10_spill] sm:$0xff] }
  0xea   : > { %3252 = vmatprep.subr.bf16.mxu0 %v5365_v61  ;;  %3306 = vmatpush3.bf16.msra.mxu1 %v3303_v10  ;;  %v5402_v10 = vld [vmem:[#allocation36_spill] sm:$0xff] }
  0xeb   : > { %2023 = vmatmul.mubr.f32.gmra.mrb[78].mxu1 %v4349_v27  ;;  %3308 = vmatprep.subr.bf16.mxu1 %v3307_v19  ;;  %v2888_v27 = vld [vmem:[%s3751_s20 + $0x199] sm:$0xff] }
  0xec   : > { %1758 = vmatmul.mubr.f32.gmra.mrb[14].mxu0 %v4117_v55  ;;  %2027 = vmatprep.mubr.f32.mxu1 %v4388_v3  ;;  %v5372_v55 = vld [vmem:[#allocation19_spill] sm:$0xff] }
  0xed   : > { %1762 = vmatprep.mubr.f32.mxu0 %v4169_v17  ;;  %3254 = vmatpush1.bf16.msra.mxu0 %v4096_v48  ;;  %v5370_v48 = vld [vmem:[#allocation8_spill] sm:$0xff]  ;;  %v5377_v17 = vld [vmem:[#allocation29_spill] sm:$0xff] }
  0xee   : > { %3255 = vmatprep.subr.bf16.mxu0 %v5365_v61  ;;  %3310 = vmatpush3.bf16.msra.mxu1 %v3307_v19 }
  0xef   : > { %2028 = vmatmul.mubr.f32.gmra.mrb[80].mxu1 %v4365_v40  ;;  %v5398_v40 = vld [vmem:[#allocation25_spill] sm:$0xff] }
  0xf0   : > { %1763 = vmatmul.mubr.f32.gmra.mrb[16].mxu0 %v4143_v5  ;;  %2032 = vmatprep.mubr.f32.mxu1 %v4401_v32  ;;  %v5375_v5 = vld [vmem:[#allocation5_spill] sm:$0xff] }
  0xf1   : > { %1767 = vmatprep.mubr.f32.mxu0 %v4198_v30  ;;  %3257 = vmatpush1.bf16.msra.mxu0 %v4122_v59  ;;  %v5373_v59 = vld [vmem:[#allocation26_spill] sm:$0xff]  ;;  %v5380_v30 = vld [vmem:[#allocation24_spill] sm:$0xff] }
  0xf2   : > { %3258 = vmatprep.subr.bf16.mxu0 %v5365_v61 }
  0xf3   : > { %2033 = vmatmul.mubr.f32.gmra.mrb[82].mxu1 %v4378_v52  ;;  %v2857_v52 = vld [vmem:[%s3751_s20 + $0x1a0] sm:$0xff] }
  0xf4   : > { %1768 = vmatmul.mubr.f32.gmra.mrb[18].mxu0 %v4172_v18  ;;  %2037 = vmatprep.mubr.f32.mxu1 %v4414_v11  ;;  %v5378_v18 = vld [vmem:[#allocation12_spill] sm:$0xff] }
  0xf5   : > { %1772 = vmatprep.mubr.f32.mxu0 %v4227_v46  ;;  %3260 = vmatpush1.bf16.msra.mxu0 %v4150_v9  ;;  %v5376_v9 = vld [vmem:[#allocation21_spill] sm:$0xff] }
  0xf6   : > { %3261 = vmatprep.subr.bf16.mxu0 %v5365_v61  ;;  %v5383_v46 = vld [vmem:[#allocation9_spill] sm:$0xff] }
  0xf7   : > { %2038 = vmatmul.mubr.f32.gmra.mrb[84].mxu1 %v4391_v12  ;;  %v5393_v12 = vld [vmem:[#allocation18_spill] sm:$0xff] }
  0xf8   : > { %1773 = vmatmul.mubr.f32.gmra.mrb[20].mxu0 %v4201_v31  ;;  %2042 = vmatprep.mubr.f32.mxu1 %v4427_v51  ;;  %v5381_v31 = vld [vmem:[#allocation32_spill] sm:$0xff] }
  0xf9   : > { %1777 = vmatprep.mubr.f32.mxu0 %v5366_v28  ;;  %3263 = vmatpush1.bf16.msra.mxu0 %v5367_v34  ;;  %v2897_v28 = vld [vmem:[%s3751_s20 + $0x82] sm:$0xff]  ;;  %v5403_v34 = vld [vmem:[#allocation38_spill] sm:$0xff] }
  0xfa   : > { %3264 = vmatprep.subr.bf16.mxu0 %v5365_v61 }
  0xfb   : > { %2043 = vmatmul.mubr.f32.gmra.mrb[86].mxu1 %v5368_v37  ;;  %v2898_v37 = vld [vmem:[%s3751_s20 + $0x92] sm:$0xff] }
  0xfc   : > { %1778 = vmatmul.mubr.f32.gmra.mrb[22].mxu0 %v4230_v47  ;;  %2047 = vmatprep.mubr.f32.mxu1 %v5369_v45  ;;  %v5384_v47 = vld [vmem:[#allocation27_spill] sm:$0xff] }
  0xfd   : > { %1782 = vmatprep.mubr.f32.mxu0 %v5370_v48  ;;  %3266 = vmatpush1.bf16.msra.mxu0 %v5371_v54  ;;  %v2899_v54 = vld [vmem:[%s3751_s20 + $0x9a] sm:$0xff] }
  0xfe   : > { %3267 = vmatprep.subr.bf16.mxu0 %v5365_v61 }
  0xff   : > { %2048 = vmatmul.mubr.f32.gmra.mrb[88].mxu1 %v5372_v55  ;;  %v5404_v55 = vld [vmem:[#allocation40_spill] sm:$0xff] }
 0x100   : > { %1783 = vmatmul.mubr.f32.gmra.mrb[24].mxu0 %v4260_v0  ;;  %2052 = vmatprep.mubr.f32.mxu1 %v5373_v59  ;;  %v5387_v0 = vld [vmem:[#allocation11_spill] sm:$0xff] }
 0x101   : > { %1787 = vmatprep.mubr.f32.mxu0 %v5374_v4  ;;  %3269 = vmatpush1.bf16.msra.mxu0 %v5375_v5 }
 0x102   : > { %3270 = vmatprep.subr.bf16.mxu0 %v5365_v61 }
 0x103   : > { %2053 = vmatmul.mubr.f32.gmra.mrb[90].mxu1 %v5376_v9  ;;  %v2901_v9 = vld [vmem:[%s3751_s20 + $0xb2] sm:$0xff] }
 0x104   : > { %1788 = vmatmul.mubr.f32.gmra.mrb[26].mxu0 %v4290_v26  ;;  %2057 = vmatprep.mubr.f32.mxu1 %v5377_v17  ;;  %v5389_v26 = vld [vmem:[#allocation37_spill] sm:$0xff] }
 0x105   : > { %1792 = vmatprep.mubr.f32.mxu0 %v5378_v18  ;;  %3272 = vmatpush1.bf16.msra.mxu0 %v5379_v21  ;;  %v2902_v18 = vld [vmem:[%s3751_s20 + $0xc2] sm:$0xff] }
 0x106   : > { %3273 = vmatprep.subr.bf16.mxu0 %v5365_v61 }
 0x107   : > { %2058 = vmatmul.mubr.f32.gmra.mrb[92].mxu1 %v5380_v30  ;;  %v4764_v30 = vld [vmem:[%s3751_s20 + $0x182] sm:$0xff] }
 0x108   : > { %1793 = vmatmul.mubr.f32.gmra.mrb[28].mxu0 %v4326_v58  ;;  %2062 = vmatprep.mubr.f32.mxu1 %v5381_v31  ;;  %v5391_v58 = vld [vmem:[#allocation33_spill] sm:$0xff] }
 0x109   : > { %1797 = vmatprep.mubr.f32.mxu0 %v5382_v35  ;;  %3275 = vmatpush1.bf16.msra.mxu0 %v5383_v46  ;;  %v2903_v35 = vld [vmem:[%s3751_s20 + $0xca] sm:$0xff] }
 0x10a   : > { %3276 = vmatprep.subr.bf16.mxu0 %v5365_v61  ;;  %v2890_v61 = vld [vmem:[%s3751_s20 + $0x32] sm:$0xff] }
 0x10b   : > { %2063 = vmatmul.mubr.f32.gmra.mrb[94].mxu1 %v5384_v47  ;;  %v4773_v47 = vld [vmem:[%s3751_s20 + $0x18a] sm:$0xff] }
 0x10c   : > { %1798 = vmatmul.mubr.f32.gmra.mrb[30].mxu0 %v4346_v20  ;;  %2067 = vmatprep.mubr.f32.mxu1 %v5385_v50  ;;  %v4705_v20 = vld [vmem:[%s3751_s20 + $0x189] sm:$0xff] }
 0x10d   : > { %1802 = vmatprep.mubr.f32.mxu0 %v5386_v63  ;;  %3278 = vmatpush1.bf16.msra.mxu0 %v5387_v0  ;;  %v2858_v63 = vld [vmem:[%s3751_s20 + $0x31] sm:$0xff] }
 0x10f   : > { %2068 = vmatmul.mubr.f32.gmra.mrb[96].mxu1 %v5388_v6  ;;  %v2826_v6 = vld [vmem:[%s3751_s20 + $0x30] sm:$0xff] }
 0x110   : > { %1803 = vmatmul.mubr.f32.gmra.mrb[32].mxu0 %v4362_v39  ;;  %2072 = vmatprep.mubr.f32.mxu1 %v5389_v26  ;;  %v2856_v39 = vld [vmem:[%s3751_s20 + $0x198] sm:$0xff] }
 0x111   : > { %1807 = vmatprep.mubr.f32.mxu0 %v5390_v29 }
 0x113   : > { %2073 = vmatmul.mubr.f32.gmra.mrb[98].mxu1 %v5391_v58  ;;  %v2859_v58 = vld [vmem:[%s3751_s20 + $0x39] sm:$0xff] }
 0x114   : > { %1808 = vmatmul.mubr.f32.gmra.mrb[34].mxu0 %v4375_v49  ;;  %2077 = vmatprep.mubr.f32.mxu1 %v4518_v36 }
 0x115   : > { %1812 = vmatprep.mubr.f32.mxu0 %v5392_v2 }
 0x117   : > { %2078 = vmatmul.mubr.f32.gmra.mrb[100].mxu1 %v4495_v57  ;;  %v5395_v57 = vld [vmem:[#allocation39_spill] sm:$0xff] }
 0x118   : > { %1813 = vmatmul.mubr.f32.gmra.mrb[36].mxu0 %v4388_v3  ;;  %2082 = vmatprep.mubr.f32.mxu1 %v4531_v22  ;;  %v5396_v3 = vld [vmem:[#allocation22_spill] sm:$0xff] }
 0x119   : > { %1817 = vmatprep.mubr.f32.mxu0 %v5393_v12 }
 0x11b   : > { %2083 = vmatmul.mubr.f32.gmra.mrb[102].mxu1 %v4508_v23 }
 0x11c   : > { %1818 = vmatmul.mubr.f32.gmra.mrb[38].mxu0 %v4401_v32  ;;  %2087 = vmatprep.mubr.f32.mxu1 %v4698_v13  ;;  %v5397_v32 = vld [vmem:[#allocation41_spill] sm:$0xff] }
 0x11d   : > { %1822 = vmatprep.mubr.f32.mxu0 %v5394_v14 }
 0x11f   : > { %2088 = vmatmul.mubr.f32.gmra.mrb[104].mxu1 %v5395_v57 }
 0x120   : > { %1823 = vmatmul.mubr.f32.gmra.mrb[40].mxu0 %v4414_v11  ;;  %2092 = vmatprep.mubr.f32.mxu1 %v4705_v20  ;;  %v2889_v11 = vld [vmem:[%s3751_s20 + $0x1a1] sm:$0xff] }
 0x121   : > { %1827 = vmatprep.mubr.f32.mxu0 %v5396_v3 }
 0x122   : > { %v4712_v23 = vpop.f32.mrb[0].mxu1 }
 0x123   : > { %2093 = vmatmul.mubr.f32.gmra.mrb[106].mxu1 %v5397_v32  ;;  %v1276_v38 = vpop.f32.mrb[1].mxu1  ;;  %v2861_v32 = vld [vmem:[%s3751_s20 + $0x51] sm:$0xff] }
 0x124   : > { %1828 = vmatmul.mubr.f32.gmra.mrb[42].mxu0 %v4427_v51  ;;  %2097 = vmatprep.mubr.f32.mxu1 %v2888_v27  ;;  %v2828_v27 = vld [vmem:[%s3751_s20 + $0x48] sm:$0xff]  ;;  %v2829_v38 = vld [vmem:[%s3751_s20 + $0x50] sm:$0xff] }
 0x125   : > { %1832 = vmatprep.mubr.f32.mxu0 %v5398_v40 }
 0x126   : > { %v4719_v43 = vpop.f32.mrb[2].mxu1 }
 0x127   : > { %2098 = vmatmul.mubr.f32.gmra.mrb[108].mxu1 %v2856_v39  ;;  %v1281_v49 = vpop.f32.mrb[3].mxu1  ;;  %v2862_v39 = vld [vmem:[%s3751_s20 + $0x61] sm:$0xff] }
 0x128   : > { %1833 = vmatmul.mubr.f32.gmra.mrb[44].mxu0 %v5369_v45  ;;  %2102 = vmatprep.mubr.f32.mxu1 %v2889_v11  ;;  %v2830_v11 = vld [vmem:[%s3751_s20 + $0x60] sm:$0xff] }
 0x129   : > { %1837 = vmatprep.mubr.f32.mxu0 %v5399_v60 }
 0x12a   : > { %v4725_v51 = vpop.f32.mrb[4].mxu1 }
 0x12b   : > { %2103 = vmatmul.mubr.f32.gmra.mrb[110].mxu1 %v2857_v52  ;;  %v1286_v53 = vpop.f32.mrb[5].mxu1  ;;  %v2863_v52 = vld [vmem:[%s3751_s20 + $0x69] sm:$0xff] }
 0x12c   : > { %1838 = vmatmul.mubr.f32.gmra.mrb[46].mxu0 %v5373_v59  ;;  %3039 = vmatprep.mubr.f32.mxu1 %v2890_v61  ;;  %v2900_v59 = vld [vmem:[%s3751_s20 + $0xaa] sm:$0xff] }
 0x12d   : > { %1842 = vmatprep.mubr.f32.mxu0 %v5400_v41  ;;  %v2831_v61 = vld [vmem:[%s3751_s20 + $0x68] sm:$0xff] }
 0x12e   : > { %v4731_v7 = vpop.f32.mrb[6].mxu1 }
 0x12f   : > { %3040 = vmatmul.mubr.f32.vlgmr.msra.gmra.mrb[112].mxu1 %v2891_v42  ;;  %v1291_v15 = vpop.f32.mrb[7].mxu1  ;;  %v2864_v42 = vld [vmem:[%s3751_s20 + $0x79] sm:$0xff] }
 0x130   : > { %1843 = vmatmul.mubr.f32.gmra.mrb[48].mxu0 %v5377_v17  ;;  %3042 = vmatprep.mubr.f32.mxu1 %v2892_v62  ;;  %v5405_v17 = vld [vmem:[#allocation42_spill] sm:$0xff] }
 0x131   : > { %1847 = vmatprep.mubr.f32.mxu0 %v5401_v8  ;;  %v2832_v62 = vld [vmem:[%s3751_s20 + $0x78] sm:$0xff] }
 0x132   : > { %v4737_v1 = vpop.f32.mrb[8].mxu1  ;;  %v2920_v15 = vld [vmem:[%s3751_s20 + $0x19a] sm:$0xff] }
 0x133   : > { %3043 = vmatmul.mubr.f32.gmra.mrb[114].mxu1 %v2893_v56  ;;  %v1296_v16 = vpop.f32.mrb[9].mxu1 }
 0x134   : > { %1848 = vmatmul.mubr.f32.gmra.mrb[50].mxu0 %v5381_v31  ;;  %3045 = vmatprep.mubr.f32.mxu1 %v2894_v24  ;;  %v2921_v16 = vld [vmem:[%s3751_s20 + $0x1a2] sm:$0xff] }
 0x135   : > { %1852 = vmatprep.mubr.f32.mxu0 %v5402_v10 }
 0x136   : > { %v4743_v44 = vpop.f32.mrb[10].mxu1 }
 0x137   : > { %3046 = vmatmul.mubr.f32.gmra.mrb[116].mxu1 %v2895_v33  ;;  %v1301_v19 = vpop.f32.mrb[11].mxu1  ;;  %v2833_v33 = vld [vmem:[%s3751_s20 + $0x80] sm:$0xff] }
 0x138   : > { %1853 = vmatmul.mubr.f32.gmra.mrb[52].mxu0 %v5385_v50  ;;  %3048 = vmatprep.mubr.f32.mxu1 %v2896_v25 }
 0x139   : > { %1857 = vmatprep.mubr.f32.mxu0 %v5403_v34 }
 0x13a   : > { %v4749_v45 = vpop.f32.mrb[12].mxu1 }
 0x13b   : > { %3049 = vmatmul.mubr.f32.gmra.mrb[118].mxu1 %v2897_v28  ;;  %v1306_v48 = vpop.f32.mrb[13].mxu1 }
 0x13c   : > { %1858 = vmatmul.mubr.f32.gmra.mrb[54].mxu0 %v5389_v26  ;;  %3051 = vmatprep.mubr.f32.mxu1 %v2898_v37 }
 0x13d   : > { %1862 = vmatprep.mubr.f32.mxu0 %v5404_v55 }
 0x13e   : > { %v4755_v4 = vpop.f32.mrb[14].mxu1 }
 0x13f   : > { %3052 = vmatmul.mubr.f32.gmra.mrb[120].mxu1 %v2899_v54  ;;  %v1311_v5 = vpop.f32.mrb[15].mxu1 }
 0x140   : > { %1863 = vmatmul.mubr.f32.gmra.mrb[56].mxu0 %v4518_v36  ;;  %3054 = vmatprep.mubr.f32.mxu1 %v2900_v59  ;;  %v2904_v36 = vld [vmem:[%s3751_s20 + $0xda] sm:$0xff] }
 0x141   : > { %1867 = vmatprep.mubr.f32.mxu0 %v5405_v17 }
 0x142   : > { %v4761_v21 = vpop.f32.mrb[16].mxu1 }
 0x143   : > { %3055 = vmatmul.mubr.f32.gmra.mrb[122].mxu1 %v2901_v9  ;;  %v1316_v31 = vpop.f32.mrb[17].mxu1 }
 0x144   : > { %1868 = vmatmul.mubr.f32.gmra.mrb[58].mxu0 %v4531_v22  ;;  %3057 = vmatprep.mubr.f32.mxu1 %v2902_v18 }
 0x145   : > { %1872 = vmatprep.mubr.f32.mxu0 %v4764_v30 }
 0x146   : > { %v4770_v46 = vpop.f32.mrb[18].mxu1 }
 0x147   : > { %3058 = vmatmul.mubr.f32.gmra.mrb[124].mxu1 %v2903_v35  ;;  %v1321_v50 = vpop.f32.mrb[19].mxu1 }
 0x148   : > { %1873 = vmatmul.mubr.f32.gmra.mrb[60].mxu0 %v4698_v13  ;;  %3060 = vmatprep.mubr.f32.mxu1 %v2904_v36 }
 0x149   : > { %1877 = vmatprep.mubr.f32.mxu0 %v4773_v47 }
 0x14a   : > { %v4777_v22 = vpop.f32.mrb[20].mxu1 }
 0x14b   : > { %3061 = vmatmul.mubr.f32.gmra.mrb[126].mxu1 %v5390_v29  ;;  %v1326_v0 = vpop.f32.mrb[21].mxu1  ;;  %v2827_v29 = vld [vmem:[%s3751_s20 + $0x38] sm:$0xff] }
 0x14c   : > { %1878 = vmatmul.mubr.f32.gmra.mrb[62].mxu0 %v4705_v20  ;;  %3063 = vmatprep.mubr.f32.mxu1 %v5392_v2  ;;  %v2860_v20 = vld [vmem:[%s3751_s20 + $0x49] sm:$0xff] }
 0x14d   : > { %1947 = vmatprep.mubr.f32.mxu0 %v2858_v63 }
 0x14e   : > { %v4784_v26 = vpop.f32.mrb[22].mxu1 }
 0x14f   : > { %3064 = vmatmul.mubr.f32.gmra.mrb[128].mxu1 %v5393_v12  ;;  %v1331_v13 = vpop.f32.mrb[23].mxu1 }
 0x150   : > { %1948 = vmatmul.mubr.f32.vlgmr.msra.gmra.mrb[0].mxu0 %v2826_v6  ;;  %3066 = vmatprep.mubr.f32.mxu1 %v5394_v14 }
 0x151   : > { %1952 = vmatprep.mubr.f32.mxu0 %v2859_v58 }
 0x152   : > { %v4790_v57 = vpop.f32.mrb[24].mxu1 }
 0x153   : > { %3067 = vmatmul.mubr.f32.gmra.mrb[130].mxu1 %v5396_v3  ;;  %v1336_v2 = vpop.f32.mrb[25].mxu1 }
 0x154   : > { %1953 = vmatmul.mubr.f32.gmra.mrb[2].mxu0 %v2827_v29  ;;  %3069 = vmatprep.mubr.f32.mxu1 %v5398_v40 }
 0x155   : > { %1957 = vmatprep.mubr.f32.mxu0 %v2860_v20 }
 0x156   : > { %v4796_v12 = vpop.f32.mrb[26].mxu1 }
 0x157   : > { %3070 = vmatmul.mubr.f32.gmra.mrb[132].mxu1 %v5399_v60  ;;  %v1341_v14 = vpop.f32.mrb[27].mxu1 }
 0x158   : > { %1958 = vmatmul.mubr.f32.gmra.mrb[4].mxu0 %v2828_v27  ;;  %3072 = vmatprep.mubr.f32.mxu1 %v5400_v41 }
 0x159   : > { %1962 = vmatprep.mubr.f32.mxu0 %v2861_v32 }
 0x15a   : > { %v4802_v3 = vpop.f32.mrb[28].mxu1 }
 0x15b   : > { %3073 = vmatmul.mubr.f32.gmra.mrb[134].mxu1 %v5401_v8  ;;  %v1346_v40 = vpop.f32.mrb[29].mxu1  ;;  %v2865_v8 = vld [vmem:[%s3751_s20 + $0x81] sm:$0xff] }
 0x15c   : > { %1963 = vmatmul.mubr.f32.gmra.mrb[6].mxu0 %v2829_v38  ;;  %3075 = vmatprep.mubr.f32.mxu1 %v5402_v10 }
 0x15d   : > { %1967 = vmatprep.mubr.f32.mxu0 %v2862_v39 }
 0x15e   : > { %v4808_v49 = vpop.f32.mrb[30].mxu1 }
 0x15f   : > { %3076 = vmatmul.mubr.f32.gmra.mrb[136].mxu1 %v5403_v34  ;;  %v1351_v60 = vpop.f32.mrb[31].mxu1 }
 0x160   : > { %1968 = vmatmul.mubr.f32.gmra.mrb[8].mxu0 %v2830_v11  ;;  %3078 = vmatprep.mubr.f32.mxu1 %v5404_v55 }
 0x161   : > { %1972 = vmatprep.mubr.f32.mxu0 %v2863_v52 }
 0x162   : > { %v4814_v53 = vpop.f32.mrb[32].mxu1 }
 0x163   : > { %3079 = vmatmul.mubr.f32.gmra.mrb[138].mxu1 %v5405_v17  ;;  %v1356_v41 = vpop.f32.mrb[33].mxu1 }
 0x164   : > { %1973 = vmatmul.mubr.f32.gmra.mrb[10].mxu0 %v2831_v61  ;;  %3081 = vmatprep.mubr.f32.mxu1 %v4764_v30 }
 0x165   : > { %1977 = vmatprep.mubr.f32.mxu0 %v2864_v42 }
 0x166   : > { %v4821_v56 = vpop.f32.mrb[34].mxu1 }
 0x167   : > { %3082 = vmatmul.mubr.f32.gmra.mrb[140].mxu1 %v4773_v47  ;;  %v1361_v24 = vpop.f32.mrb[35].mxu1 }
 0x168   : > { %1978 = vmatmul.mubr.f32.gmra.mrb[12].mxu0 %v2832_v62  ;;  %3084 = vmatprep.mubr.f32.mxu1 %v2920_v15 }
 0x169   : > { %1982 = vmatprep.mubr.f32.mxu0 %v2865_v8 }
 0x16a   : > { %v4827_v10 = vpop.f32.mrb[36].mxu1 }
 0x16b   : > { %3085 = vmatmul.mubr.f32.gmra.mrb[142].mxu1 %v2921_v16  ;;  %v1366_v25 = vpop.f32.mrb[37].mxu1 }
 0x16c   : > { %1983 = vmatmul.mubr.f32.gmra.mrb[14].mxu0 %v2833_v33 }
 0x16e   : > { %v4829_v19 = vpop.f32.mrb[38].mxu1 }
 0x16f   : > { %v1371_v28 = vpop.f32.mrb[39].mxu1 }
 0x172   : > { %v4831_v34 = vpop.f32.mrb[40].mxu1 }
 0x173   : > { %v1376_v37 = vpop.f32.mrb[41].mxu1 }
 0x176   : > { %v4833_v48 = vpop.f32.mrb[42].mxu1 }
 0x177   : > { %v1381_v54 = vpop.f32.mrb[43].mxu1 }
 0x17a   : > { %v4835_v55 = vpop.f32.mrb[44].mxu1 }
 0x17b   : > { %v1386_v59 = vpop.f32.mrb[45].mxu1 }
 0x17e   : > { %v4837_v5 = vpop.f32.mrb[46].mxu1 }
 0x17f   : > { %v1391_v9 = vpop.f32.mrb[47].mxu1 }
 0x182   : > { %v4839_v17 = vpop.f32.mrb[48].mxu1 }
 0x183   : > { %v1396_v18 = vpop.f32.mrb[49].mxu1 }
 0x186   : > { %v4841_v30 = vpop.f32.mrb[50].mxu1 }
 0x187   : > { %v1401_v31 = vpop.f32.mrb[51].mxu1 }
 0x18a   : > { %v4843_v35 = vpop.f32.mrb[52].mxu1 }
 0x18b   : > { %v1406_v36 = vpop.f32.mrb[53].mxu1 }
 0x18e   : > { %v4845_v47 = vpop.f32.mrb[54].mxu1 }
 0x18f   : > { %v1411_v50 = vpop.f32.mrb[55].mxu1 }
 0x192   : > { %v4847_v63 = vpop.f32.mrb[56].mxu1 }
 0x193   : > { %v1416_v0 = vpop.f32.mrb[57].mxu1 }
 0x196   : > { %v4849_v6 = vpop.f32.mrb[58].mxu1 }
 0x197   : > { %v1421_v58 = vpop.f32.mrb[59].mxu1 }
 0x19a   : > { %v4851_v13 = vpop.f32.mrb[60].mxu1 }
 0x19b   : > { %v1426_v29 = vpop.f32.mrb[61].mxu1 }
 0x19e   : > { %v4853_v20 = vpop.f32.mrb[62].mxu1 }
 0x19f   : > { %v1431_v2 = vpop.f32.mrb[63].mxu1 }
 0x1a2   : > { %v1989_v27 = vpop.f32.mrb[64].mxu1 }
 0x1a3   : > { %v1991_v32 = vpop.f32.mrb[65].mxu1 }
 0x1a6   : > { %v1994_v14 = vpop.f32.mrb[66].mxu1 }
 0x1a7   : > { %v1996_v38 = vpop.f32.mrb[67].mxu1 }
 0x1aa   : > { %v1999_v39 = vpop.f32.mrb[68].mxu1 }
 0x1ab   : > { %v2001_v40 = vpop.f32.mrb[69].mxu1 }
 0x1ae   : > { %v2004_v11 = vpop.f32.mrb[70].mxu1 }
 0x1af   : > { %v2006_v52 = vpop.f32.mrb[71].mxu1 }
 0x1b2   : > { %v2009_v60 = vpop.f32.mrb[72].mxu1 }
 0x1b3   : > { %v2011_v61 = vpop.f32.mrb[73].mxu1 }
 0x1b6   : > { %v2014_v42 = vpop.f32.mrb[74].mxu1 }
 0x1b7   : > { %v2016_v41 = vpop.f32.mrb[75].mxu1 }
 0x1ba   : > { %v2019_v62 = vpop.f32.mrb[76].mxu1 }
 0x1bb   : > { %v2021_v15 = vpop.f32.mrb[77].mxu1 }
 0x1be   : > { %v2024_v8 = vpop.f32.mrb[78].mxu1 }
 0x1bf   : > { %v2026_v24 = vpop.f32.mrb[79].mxu1 }
 0x1c2   : > { %v2029_v16 = vpop.f32.mrb[80].mxu1 }
 0x1c3   : > { %v1764_v33 = vpop.f32.mrb[16].mxu0  ;;  %v2031_v25 = vpop.f32.mrb[81].mxu1 }
 0x1c4   : > { %v3351_v28 = vadd.f32 %v1764_v33, %v4761_v21  ;;  %v1766_v37 = vpop.f32.mrb[17].mxu0 }
 0x1c6   : > { %v2034_v54 = vpop.f32.mrb[82].mxu1  ;;  %v4856_v59 = vadd.f32 %v3351_v28, %v1989_v27 }
 0x1c7   : > { %v1769_v9 = vpop.f32.mrb[18].mxu0  ;;  %v2036_v18 = vpop.f32.mrb[83].mxu1 }
 0x1c8   : > { %v3353_v31 = vadd.f32 %v1769_v9, %v4770_v46  ;;  %v1771_v36 = vpop.f32.mrb[19].mxu0 }
 0x1ca   : > { %v2039_v50 = vpop.f32.mrb[84].mxu1  ;;  %v4859_v0 = vadd.f32 %v3353_v31, %v1994_v14 }
 0x1cb   : > { %v1774_v58 = vpop.f32.mrb[20].mxu0  ;;  %v2041_v29 = vpop.f32.mrb[85].mxu1 }
 0x1cc   : > { %v3355_v2 = vadd.f32 %v1774_v58, %v4777_v22  ;;  %v1776_v32 = vpop.f32.mrb[21].mxu0 }
 0x1ce   : > { %v2044_v38 = vpop.f32.mrb[86].mxu1  ;;  %v4862_v40 = vadd.f32 %v3355_v2, %v1999_v39 }
 0x1cf   : > { %v1779_v21 = vpop.f32.mrb[22].mxu0  ;;  %v2046_v52 = vpop.f32.mrb[87].mxu1 }
 0x1d0   : > { %v3357_v27 = vadd.f32 %v1779_v21, %v4784_v26  ;;  %v1781_v61 = vpop.f32.mrb[23].mxu0 }
 0x1d2   : > { %v2049_v41 = vpop.f32.mrb[88].mxu1  ;;  %v4865_v15 = vadd.f32 %v3357_v27, %v2004_v11 }
 0x1d3   : > { %v1784_v46 = vpop.f32.mrb[24].mxu0  ;;  %v2051_v24 = vpop.f32.mrb[89].mxu1 }
 0x1d4   : > { %v3359_v14 = vadd.f32 %v1784_v46, %v4790_v57  ;;  %v1786_v33 = vpop.f32.mrb[25].mxu0 }
 0x1d6   : > { %v2054_v25 = vpop.f32.mrb[90].mxu1  ;;  %v4868_v28 = vadd.f32 %v3359_v14, %v2009_v60 }
 0x1d7   : > { %v1789_v22 = vpop.f32.mrb[26].mxu0  ;;  %v2056_v37 = vpop.f32.mrb[91].mxu1 }
 0x1d8   : > { %v3361_v39 = vadd.f32 %v1789_v22, %v4796_v12  ;;  %v1791_v9 = vpop.f32.mrb[27].mxu0 }
 0x1da   : > { %v2059_v18 = vpop.f32.mrb[92].mxu1  ;;  %v4871_v31 = vadd.f32 %v3361_v39, %v2014_v42 }
 0x1db   : > { %v1794_v26 = vpop.f32.mrb[28].mxu0  ;;  %v2061_v36 = vpop.f32.mrb[93].mxu1 }
 0x1dc   : > { %v3363_v11 = vadd.f32 %v1794_v26, %v4802_v3  ;;  %v1796_v58 = vpop.f32.mrb[29].mxu0 }
 0x1de   : > { %v2064_v29 = vpop.f32.mrb[94].mxu1  ;;  %v4874_v2 = vadd.f32 %v3363_v11, %v2019_v62 }
 0x1df   : > { %v1799_v57 = vpop.f32.mrb[30].mxu0  ;;  %v2066_v32 = vpop.f32.mrb[95].mxu1 }
 0x1e0   : > { %v3365_v60 = vadd.f32 %v1799_v57, %v4808_v49  ;;  %v1801_v21 = vpop.f32.mrb[31].mxu0 }
 0x1e2   : > { %v2069_v52 = vpop.f32.mrb[96].mxu1  ;;  %v4877_v27 = vadd.f32 %v3365_v60, %v2024_v8 }
 0x1e3   : > { %v1804_v12 = vpop.f32.mrb[32].mxu0  ;;  %v2071_v61 = vpop.f32.mrb[97].mxu1 }
 0x1e4   : > { %v3367_v42 = vadd.f32 %v1804_v12, %v4814_v53  ;;  %v1806_v46 = vpop.f32.mrb[33].mxu0 }
 0x1e6   : > { %v2074_v24 = vpop.f32.mrb[98].mxu1  ;;  %v4880_v14 = vadd.f32 %v3367_v42, %v2029_v16 }
 0x1e7   : > { %v1809_v3 = vpop.f32.mrb[34].mxu0  ;;  %v2076_v33 = vpop.f32.mrb[99].mxu1 }
 0x1e8   : > { %v3369_v62 = vadd.f32 %v1809_v3, %v4821_v56  ;;  %v1811_v22 = vpop.f32.mrb[35].mxu0 }
 0x1ea   : > { %v2079_v37 = vpop.f32.mrb[100].mxu1  ;;  %v4883_v39 = vadd.f32 %v3369_v62, %v2034_v54 }
 0x1eb   : > { %v1814_v49 = vpop.f32.mrb[36].mxu0  ;;  %v2081_v9 = vpop.f32.mrb[101].mxu1 }
 0x1ec   : > { %v3371_v8 = vadd.f32 %v1814_v49, %v4827_v10  ;;  %v1816_v26 = vpop.f32.mrb[37].mxu0 }
 0x1ee   : > { %v2084_v36 = vpop.f32.mrb[102].mxu1  ;;  %v4886_v11 = vadd.f32 %v3371_v8, %v2039_v50 }
 0x1ef   : > { %v1819_v53 = vpop.f32.mrb[38].mxu0  ;;  %v2086_v58 = vpop.f32.mrb[103].mxu1 }
 0x1f0   : > { %v3373_v16 = vadd.f32 %v1819_v53, %v4829_v19  ;;  %v1821_v57 = vpop.f32.mrb[39].mxu0 }
 0x1f2   : > { %v2089_v32 = vpop.f32.mrb[104].mxu1  ;;  %v4889_v60 = vadd.f32 %v3373_v16, %v2044_v38 }
 0x1f3   : > { %v1824_v56 = vpop.f32.mrb[40].mxu0  ;;  %v2091_v21 = vpop.f32.mrb[105].mxu1 }
 0x1f4   : > { %v3375_v54 = vadd.f32 %v1824_v56, %v4831_v34  ;;  %v1826_v12 = vpop.f32.mrb[41].mxu0 }
 0x1f6   : > { %v4892_v61 = vpop.f32.mrb[106].mxu1  ;;  %v4894_v10 = vadd.f32 %v3375_v54, %v2049_v41 }
 0x1f7   : > { %v1829_v42 = vpop.f32.mrb[42].mxu0  ;;  %v2096_v50 = vpop.f32.mrb[107].mxu1 }
 0x1f8   : > { %v3377_v46 = vadd.f32 %v1829_v42, %v4833_v48  ;;  %v1831_v3 = vpop.f32.mrb[43].mxu0 }
 0x1fa   : > { %v4897_v33 = vpop.f32.mrb[108].mxu1  ;;  %v4899_v19 = vadd.f32 %v3377_v46, %v2054_v25 }
 0x1fb   : > { %v1834_v38 = vpop.f32.mrb[44].mxu0  ;;  %v2101_v62 = vpop.f32.mrb[109].mxu1 }
 0x1fc   : > { %v3379_v22 = vadd.f32 %v1834_v38, %v4835_v55  ;;  %v1836_v49 = vpop.f32.mrb[45].mxu0 }
 0x1fe   : > { %v4902_v34 = vpop.f32.mrb[110].mxu1  ;;  %v4904_v9 = vadd.f32 %v3379_v22, %v2059_v18 }
 0x1ff   : > { %v1839_v41 = vpop.f32.mrb[46].mxu0  ;;  %v2106_v8 = vpop.f32.mrb[111].mxu1 }
 0x200   : > { %v3381_v26 = vadd.f32 %v1839_v41, %v4837_v5  ;;  %v1841_v53 = vpop.f32.mrb[47].mxu0 }
 0x202   : > { %v4907_v48 = vpop.f32.mrb[112].mxu1  ;;  %v4909_v58 = vadd.f32 %v3381_v26, %v2064_v29 }
 0x203   : > { %v1844_v25 = vpop.f32.mrb[48].mxu0  ;;  %v4911_v16 = vpop.f32.mrb[113].mxu1 }
 0x204   : > { %v3383_v57 = vadd.f32 %v1844_v25, %v4839_v17  ;;  %v1846_v55 = vpop.f32.mrb[49].mxu0  ;;  %v4947_v25 = vld [vmem:[%s5262_s3] ss:$0 sm:$0xff] }
 0x206   : > { %v4914_v56 = vpop.f32.mrb[114].mxu1  ;;  %v4916_v21 = vadd.f32 %v3383_v57, %v2069_v52 }
 0x207   : > { %v1849_v18 = vpop.f32.mrb[50].mxu0  ;;  %v4918_v54 = vpop.f32.mrb[115].mxu1 }
 0x208   : > { %v3385_v5 = vadd.f32 %v1849_v18, %v4841_v30  ;;  %v1851_v12 = vpop.f32.mrb[51].mxu0 }
 0x20a   : > { %v4921_v42 = vpop.f32.mrb[116].mxu1  ;;  %v4923_v29 = vadd.f32 %v3385_v5, %v2074_v24  ;;  %v4938_v24 = vld [vmem:[%s5261_s2] ss:$0 sm:$0xff] }
 0x20b   : > { %v1854_v50 = vpop.f32.mrb[52].mxu0  ;;  %v4925_v46 = vpop.f32.mrb[117].mxu1 }
 0x20c   : > { %v3387_v17 = vadd.f32 %v1854_v50, %v4843_v35  ;;  %v1856_v3 = vpop.f32.mrb[53].mxu0 }
 0x20e   : > { %v4928_v38 = vpop.f32.mrb[118].mxu1  ;;  %v4930_v52 = vadd.f32 %v3387_v17, %v2079_v37 }
 0x20f   : > { %v1859_v62 = vpop.f32.mrb[54].mxu0  ;;  %v4932_v22 = vpop.f32.mrb[119].mxu1 }
 0x210   : > { %v3389_v30 = vadd.f32 %v1859_v62, %v4845_v47  ;;  %v1861_v49 = vpop.f32.mrb[55].mxu0 }
 0x212   : > { %v3053_v41 = vpop.f32.mrb[120].mxu1  ;;  %v4940_v8 = vadd.f32 %v3389_v30, %v2084_v36 }
 0x213   : > { %v1864_v35 = vpop.f32.mrb[56].mxu0  ;;  %v2220_v26 = vadd.f32 %v4859_v0, %v3053_v41  ;;  %v2214_v53 = vpop.f32.mrb[121].mxu1 }
 0x214   : > { %v3391_v37 = vadd.f32 %v1864_v35, %v4847_v63  ;;  %v1866_v47 = vpop.f32.mrb[57].mxu0  ;;  %v2215_v57 = vadd.f32 %v4856_v59, %v2214_v53 }
 0x215   : > { %v2349_v55 = vmul.f32 %v4938_v24, %v2220_v26 }
 0x216   : > { %v2348_v18 = vmul.f32 %v4938_v24, %v2215_v57  ;;  %v3056_v36 = vpop.f32.mrb[122].mxu1  ;;  %v4952_v5 = vadd.f32 %v3391_v37, %v2089_v32 }
 0x217   : > { %v4955_v0 = vadd.f32 %v4947_v25, %v2349_v55  ;;  %v1869_v12 = vpop.f32.mrb[58].mxu0  ;;  %v2230_v63 = vadd.f32 %v4865_v15, %v3056_v36  ;;  %v2224_v50 = vpop.f32.mrb[123].mxu1 }
 0x218   : > { %v4959_v17 = vadd.f32 %v4947_v25, %v2348_v18  ;;  %v3393_v3 = vadd.f32 %v1869_v12, %v4849_v6  ;;  %v1871_v59 = vpop.f32.mrb[59].mxu0  ;;  %v2225_v62 = vadd.f32 %v4862_v40, %v2224_v50 }
 0x219   : > { %v2933_v30 = vmul.f32 -1.442695, %v4955_v0  ;;  %v2351_v32 = vmul.f32 %v4938_v24, %v2230_v63 }
 0x21a   : > { %v2932_v49 = vmul.f32 -1.442695, %v4959_v17  ;;  %v2350_v41 = vmul.f32 %v4938_v24, %v2225_v62  ;;  %v3059_v35 = vpop.f32.mrb[124].mxu1  ;;  %v4968_v15 = vadd.f32 %v3393_v3, %v4892_v61 }
 0x21b   : > { %3489 = vpow2.f32 %v2933_v30  ;;  %v4971_v26 = vadd.f32 %v4947_v25, %v2351_v32  ;;  %v1874_v6 = vpop.f32.mrb[60].mxu0  ;;  %v2240_v53 = vadd.f32 %v4871_v31, %v3059_v35  ;;  %v2234_v40 = vpop.f32.mrb[125].mxu1 }
 0x21c   : > { %3491 = vpow2.f32 %v2932_v49  ;;  %v4975_v37 = vadd.f32 %v4947_v25, %v2350_v41  ;;  %v3395_v47 = vadd.f32 %v1874_v6, %v4851_v13  ;;  %v1876_v57 = vpop.f32.mrb[61].mxu0  ;;  %v2235_v55 = vadd.f32 %v4868_v28, %v2234_v40 }
 0x21d   : > { %v2935_v61 = vmul.f32 -1.442695, %v4971_v26  ;;  %v2353_v18 = vmul.f32 %v4938_v24, %v2240_v53 }
 0x21e   : > { %v2934_v36 = vmul.f32 -1.442695, %v4975_v37  ;;  %v2352_v12 = vmul.f32 %v4938_v24, %v2235_v55  ;;  %v3062_v63 = vpop.f32.mrb[126].mxu1  ;;  %v4984_v31 = vadd.f32 %v3395_v47, %v4897_v33 }
 0x21f   : > { %3493 = vpow2.f32 %v2935_v61  ;;  %v4987_v50 = vadd.f32 %v4947_v25, %v2353_v18  ;;  %v1879_v13 = vpop.f32.mrb[62].mxu0  ;;  %v2250_v3 = vadd.f32 %v4877_v27, %v3062_v63  ;;  %v2244_v28 = vpop.f32.mrb[127].mxu1 }
 0x220   : > { %3495 = vpow2.f32 %v2934_v36  ;;  %v4991_v59 = vadd.f32 %v4947_v25, %v2352_v12  ;;  %v3397_v62 = vadd.f32 %v1879_v13, %v4853_v20  ;;  %v1881_v30 = vpop.f32.mrb[63].mxu0  ;;  %v2245_v32 = vadd.f32 %v4874_v2, %v2244_v28 }
 0x221   : > { %v2937_v33 = vmul.f32 -1.442695, %v4987_v50  ;;  %v2355_v49 = vmul.f32 %v4938_v24, %v2250_v3 }
 0x222   : > { %v2936_v41 = vmul.f32 -1.442695, %v4991_v59  ;;  %v2354_v35 = vmul.f32 %v4938_v24, %v2245_v32  ;;  %v3065_v6 = vpop.f32.mrb[128].mxu1  ;;  %v5000_v27 = vadd.f32 %v3397_v62, %v4902_v34 }
 0x223   : > { %3497 = vpow2.f32 %v2937_v33  ;;  %v5003_v53 = vadd.f32 %v4947_v25, %v2355_v49  ;;  %v1949_v20 = vpop.f32.mrb[0].mxu0  ;;  %v2260_v40 = vadd.f32 %v4883_v39, %v3065_v6  ;;  %v2254_v2 = vpop.f32.mrb[129].mxu1 }
 0x224   : > { %3499 = vpow2.f32 %v2936_v41  ;;  %v5007_v47 = vadd.f32 %v4947_v25, %v2354_v35  ;;  %v3343_v57 = vadd.f32 %v1949_v20, %v4712_v23  ;;  %v1951_v55 = vpop.f32.mrb[1].mxu0  ;;  %v2255_v61 = vadd.f32 %v4880_v14, %v2254_v2 }
 0x225   : > { %v3490_v18 = vpop.eup %3489  ;;  %v2939_v34 = vmul.f32 -1.442695, %v5003_v53  ;;  %v2357_v36 = vmul.f32 %v4938_v24, %v2260_v40 }
 0x226   : > { %v3492_v12 = vpop.eup %3491  ;;  %v2516_v63 = vadd.f32 1.0, %v3490_v18  ;;  %v2938_v13 = vmul.f32 -1.442695, %v5007_v47  ;;  %v2175_v39 = vadd.f32 %v3343_v57, %v4911_v16  ;;  %v2356_v3 = vmul.f32 %v4938_v24, %v2255_v61  ;;  %v3068_v28 = vpop.f32.mrb[130].mxu1 }
 0x227   : > { %v2515_v62 = vadd.f32 1.0, %v3492_v12  ;;  %3501 = vpow2.f32 %v2939_v34  ;;  %v5017_v23 = vadd.f32 %v4947_v25, %v2357_v36  ;;  %v1954_v14 = vpop.f32.mrb[2].mxu0  ;;  %v2270_v30 = vadd.f32 %v4889_v60, %v3068_v28  ;;  %v2264_v32 = vpop.f32.mrb[131].mxu1 }
 0x228   : > { %3503 = vrcp.f32 %v2516_v63  ;;  %v2340_v33 = vmul.f32 %v4938_v24, %v2175_v39  ;;  %v5022_v49 = vadd.f32 %v4947_v25, %v2356_v3  ;;  %v3344_v16 = vadd.f32 %v1954_v14, %v4719_v43  ;;  %v1956_v41 = vpop.f32.mrb[3].mxu0 }
 0x229   : > { %v3494_v35 = vpop.eup %3493  ;;  %3505 = vrcp.f32 %v2515_v62  ;;  %v2941_v6 = vmul.f32 -1.442695, %v5017_v23  ;;  %v2359_v20 = vmul.f32 %v4938_v24, %v2270_v30  ;;  %v2265_v40 = vadd.f32 %v4886_v11, %v2264_v32 }
 0x22a   : > { %v3496_v2 = vpop.eup %3495  ;;  %v2518_v60 = vadd.f32 1.0, %v3494_v35  ;;  %3507 = vpow2.f32 %v2938_v13  ;;  %v5029_v57 = vadd.f32 %v4947_v25, %v2340_v33  ;;  %v2940_v55 = vmul.f32 -1.442695, %v5022_v49  ;;  %v3071_v61 = vpop.f32.mrb[132].mxu1 }
 0x22b   : > { %v2517_v18 = vadd.f32 1.0, %v3496_v2  ;;  %3509 = vpow2.f32 %v2941_v6  ;;  %v2180_v43 = vadd.f32 %v3344_v16, %v4907_v48  ;;  %v5034_v34 = vadd.f32 %v4947_v25, %v2359_v20  ;;  %v1959_v36 = vpop.f32.mrb[4].mxu0  ;;  %v2274_v12 = vpop.f32.mrb[133].mxu1 }
 0x22c   : > { %3511 = vrcp.f32 %v2518_v60  ;;  %v2924_v11 = vmul.f32 -1.442695, %v5029_v57  ;;  %v2358_v63 = vmul.f32 %v4938_v24, %v2265_v40  ;;  %v3345_v13 = vadd.f32 %v1959_v36, %v4725_v51  ;;  %v1961_v39 = vpop.f32.mrb[5].mxu0 }
 0x22d   : > { %v3498_v3 = vpop.eup %3497  ;;  %3513 = vrcp.f32 %v2517_v18  ;;  %v2341_v28 = vmul.f32 %v4938_v24, %v2180_v43  ;;  %v2943_v48 = vmul.f32 -1.442695, %v5034_v34  ;;  %v2280_v62 = vadd.f32 %v4899_v19, %v3071_v61 }
 0x22e   : > { %v3500_v14 = vpop.eup %3499  ;;  %v2520_v30 = vadd.f32 1.0, %v3498_v3  ;;  %3515 = vpow2.f32 %v2924_v11  ;;  %v5043_v32 = vadd.f32 %v4947_v25, %v2358_v63  ;;  %v2185_v33 = vadd.f32 %v3345_v13, %v4918_v54  ;;  %v3074_v16 = vpop.f32.mrb[134].mxu1 }
 0x22f   : > { %v2519_v51 = vadd.f32 1.0, %v3500_v14  ;;  %3517 = vpow2.f32 %v2940_v55  ;;  %v5048_v41 = vadd.f32 %v4947_v25, %v2341_v28  ;;  %v2361_v35 = vmul.f32 %v4938_v24, %v2280_v62  ;;  %v1964_v6 = vpop.f32.mrb[6].mxu0  ;;  %v2284_v20 = vpop.f32.mrb[135].mxu1 }
 0x230   : > { %3519 = vrcp.f32 %v2520_v30  ;;  %v2942_v19 = vmul.f32 -1.442695, %v5043_v32  ;;  %v2342_v40 = vmul.f32 %v4938_v24, %v2185_v33  ;;  %v2275_v2 = vadd.f32 %v4894_v10, %v2274_v12  ;;  %v1966_v60 = vpop.f32.mrb[7].mxu0 }
 0x231   : > { %v3502_v54 = vpop.eup %3501  ;;  %3521 = vrcp.f32 %v2519_v51  ;;  %v2925_v61 = vmul.f32 -1.442695, %v5048_v41  ;;  %v5056_v55 = vadd.f32 %v4947_v25, %v2361_v35  ;;  %v3346_v18 = vadd.f32 %v1964_v6, %v4731_v7 }
 0x232   : > { %v3504_v43 = vpop.eup %3503  ;;  %v2522_v36 = vadd.f32 1.0, %v3502_v54  ;;  %3523 = vpow2.f32 %v2943_v48  ;;  %v5065_v10 = vadd.f32 %v4947_v25, %v2342_v40  ;;  %v2360_v12 = vmul.f32 %v4938_v24, %v2275_v2  ;;  %v3077_v11 = vpop.f32.mrb[136].mxu1 }
 0x233   : > { %v3506_v63 = vpop.eup %3505  ;;  %v2612_v13 = vmul.f32 %v3504_v43, %v4955_v0  ;;  %3525 = vpow2.f32 %v2925_v61  ;;  %v2945_v7 = vmul.f32 -1.442695, %v5056_v55  ;;  %v2190_v39 = vadd.f32 %v3346_v18, %v4914_v56  ;;  %v1969_v3 = vpop.f32.mrb[8].mxu0 }
 0x234   : > { %v5071_v28 = vpop.f32.mrb[137].mxu1  ;;  %v3508_v48 = vpop.eup %3507  ;;  %v2611_v62 = vmul.f32 %v3506_v63, %v4959_v17  ;;  %3527 = vrcp.f32 %v2522_v36  ;;  %v2926_v14 = vmul.f32 -1.442695, %v5065_v10  ;;  %v5076_v30 = vadd.f32 %v4947_v25, %v2360_v12 }
 0x235   : > { %v1971_v33 = vpop.f32.mrb[9].mxu0  ;;  %v3510_v0 = vpop.eup %3509  ;;  %2644 = vst [vmem:[%s5062_s10 + $0x48] sm:$0xff] %v2612_v13  ;;  %v2521_v51 = vadd.f32 1.0, %v3508_v48  ;;  %3529 = vpow2.f32 %v2942_v19  ;;  %v2343_v56 = vmul.f32 %v4938_v24, %v2190_v39  ;;  %v2290_v35 = vadd.f32 %v4909_v58, %v3074_v16 }
 0x236   : > { %v3512_v6 = vpop.eup %3511  ;;  %2643 = vst [vmem:[%s5062_s10 + $0x40] sm:$0xff] %v2611_v62  ;;  %v2524_v40 = vadd.f32 1.0, %v3510_v0  ;;  %3531 = vpow2.f32 %v2926_v14  ;;  %v2944_v17 = vmul.f32 -1.442695, %v5076_v30  ;;  %v2285_v2 = vadd.f32 %v4904_v9, %v2284_v20  ;;  %v5084_v60 = vpop.f32.mrb[138].mxu1 }
 0x237   : > { %v3514_v54 = vpop.eup %3513  ;;  %v2614_v61 = vmul.f32 %v3512_v6, %v4971_v26  ;;  %3533 = vrcp.f32 %v2521_v51  ;;  %v5088_v19 = vadd.f32 %v4947_v25, %v2343_v56  ;;  %v2363_v58 = vmul.f32 %v4938_v24, %v2290_v35  ;;  %v1974_v16 = vpop.f32.mrb[10].mxu0 }
 0x238   : > { %v5091_v18 = vpop.f32.mrb[139].mxu1  ;;  %v3516_v43 = vpop.eup %3515  ;;  %v2613_v36 = vmul.f32 %v3514_v54, %v4975_v37  ;;  %3535 = vrcp.f32 %v2524_v40  ;;  %v2362_v9 = vmul.f32 %v4938_v24, %v2285_v2  ;;  %v3347_v20 = vadd.f32 %v1969_v3, %v4737_v1 }
 0x239   : > { %v1976_v12 = vpop.f32.mrb[11].mxu0  ;;  %v3518_v26 = vpop.eup %3517  ;;  %2646 = vst [vmem:[%s5062_s10 + $0x58] sm:$0xff] %v2614_v61  ;;  %v2507_v63 = vadd.f32 1.0, %v3516_v43  ;;  %3537 = vpow2.f32 %v2945_v7  ;;  %v2927_v13 = vmul.f32 -1.442695, %v5088_v19  ;;  %v5099_v39 = vadd.f32 %v4947_v25, %v2363_v58 }
 0x23a   : > { %v3520_v48 = vpop.eup %3519  ;;  %2645 = vst [vmem:[%s5062_s10 + $0x50] sm:$0xff] %v2613_v36  ;;  %v2523_v62 = vadd.f32 1.0, %v3518_v26  ;;  %3539 = vpow2.f32 %v2944_v17  ;;  %v5103_v37 = vadd.f32 %v4947_v25, %v2362_v9  ;;  %v2195_v14 = vadd.f32 %v3347_v20, %v4925_v46  ;;  %v5106_v1 = vpop.f32.mrb[140].mxu1 }
 0x23b   : > { %v3522_v3 = vpop.eup %3521  ;;  %v2616_v7 = vmul.f32 %v3520_v48, %v4987_v50  ;;  %3541 = vrcp.f32 %v2507_v63  ;;  %v2947_v33 = vmul.f32 -1.442695, %v5099_v39  ;;  %v2300_v0 = vadd.f32 %v4923_v29, %v3077_v11  ;;  %v1979_v51 = vpop.f32.mrb[12].mxu0 }
 0x23c   : > { %v5111_v56 = vpop.f32.mrb[141].mxu1  ;;  %v3524_v35 = vpop.eup %3523  ;;  %v2615_v6 = vmul.f32 %v3522_v3, %v4991_v59  ;;  %3543 = vrcp.f32 %v2523_v62  ;;  %v2946_v46 = vmul.f32 -1.442695, %v5103_v37  ;;  %v2344_v40 = vmul.f32 %v4938_v24, %v2195_v14 }
 0x23d   : > { %v1981_v17 = vpop.f32.mrb[13].mxu0  ;;  %v3526_v2 = vpop.eup %3525  ;;  %2648 = vst [vmem:[%s5062_s10 + $0x68] sm:$0xff] %v2616_v7  ;;  %v2526_v50 = vadd.f32 1.0, %v3524_v35  ;;  %3545 = vpow2.f32 %v2927_v13  ;;  %v2365_v54 = vmul.f32 %v4938_v24, %v2300_v0  ;;  %v2295_v29 = vadd.f32 %v4916_v21, %v5071_v28 }
 0x23e   : > { %v3528_v11 = vpop.eup %3527  ;;  %2647 = vst [vmem:[%s5062_s10 + $0x60] sm:$0xff] %v2615_v6  ;;  %v2508_v61 = vadd.f32 1.0, %v3526_v2  ;;  %3547 = vpow2.f32 %v2947_v33  ;;  %v5122_v59 = vadd.f32 %v4947_v25, %v2344_v40  ;;  %v3348_v58 = vadd.f32 %v1974_v16, %v4743_v44  ;;  %v5125_v43 = vpop.f32.mrb[142].mxu1 }
 0x23f   : > { %v3530_v36 = vpop.eup %3529  ;;  %v2618_v9 = vmul.f32 %v3528_v11, %v5003_v53  ;;  %3549 = vrcp.f32 %v2526_v50  ;;  %v5129_v20 = vadd.f32 %v4947_v25, %v2365_v54  ;;  %v2364_v21 = vmul.f32 %v4938_v24, %v2295_v29  ;;  %v5132_v28 = vpop.f32.mrb[14].mxu0 }
 0x240   : > { %v5134_v12 = vpop.f32.mrb[143].mxu1  ;;  %v3532_v26 = vpop.eup %3531  ;;  %3551 = vrcp.f32 %v2508_v61  ;;  %v2525_v63 = vadd.f32 1.0, %v3530_v36  ;;  %v2928_v44 = vmul.f32 -1.442695, %v5122_v59  ;;  %v2200_v16 = vadd.f32 %v3348_v58, %v4921_v42 }
 0x241   : > { %v1986_v13 = vpop.f32.mrb[15].mxu0  ;;  %v3534_v48 = vpop.eup %3533  ;;  %2650 = vst [vmem:[%s5062_s10 + $0x78] sm:$0xff] %v2618_v9  ;;  %v2509_v53 = vadd.f32 1.0, %v3532_v26  ;;  %3553 = vpow2.f32 %v2946_v46  ;;  %v2949_v62 = vmul.f32 -1.442695, %v5129_v20  ;;  %v5141_v14 = vadd.f32 %v4947_v25, %v2364_v21 }
 0x242   : > { %v3536_v3 = vpop.eup %3535  ;;  %v2617_v7 = vmul.f32 %v3534_v48, %v5007_v47  ;;  %3555 = vrcp.f32 %v2525_v63  ;;  %v2345_v33 = vmul.f32 %v4938_v24, %v2200_v16  ;;  %v2310_v42 = vadd.f32 %v4940_v8, %v5084_v60 }
 0x243   : > { %v3538_v0 = vpop.eup %3537  ;;  %v2620_v35 = vmul.f32 %v3536_v3, %v5017_v23  ;;  %3557 = vrcp.f32 %v2509_v53  ;;  %v2948_v6 = vmul.f32 -1.442695, %v5141_v14  ;;  %v2305_v46 = vadd.f32 %v4930_v52, %v5091_v18 }
 0x244   : > { %v3540_v40 = vpop.eup %3539  ;;  %2649 = vst [vmem:[%s5062_s10 + $0x70] sm:$0xff] %v2617_v7  ;;  %v2528_v17 = vadd.f32 1.0, %v3538_v0  ;;  %3559 = vpow2.f32 %v2928_v44  ;;  %v5153_v47 = vadd.f32 %v4947_v25, %v2345_v33  ;;  %v2367_v2 = vmul.f32 %v4938_v24, %v2310_v42 }
 0x245   : > { %v3542_v50 = vpop.eup %3541  ;;  %2652 = vst [vmem:[%s5062_s10 + $0x88] sm:$0xff] %v2620_v35  ;;  %v2527_v8 = vadd.f32 1.0, %v3540_v40  ;;  %3561 = vpow2.f32 %v2949_v62  ;;  %v2366_v23 = vmul.f32 %v4938_v24, %v2305_v46  ;;  %v3349_v60 = vadd.f32 %v1979_v51, %v4749_v45 }
 0x246   : > { %v3544_v54 = vpop.eup %3543  ;;  %v2603_v52 = vmul.f32 %v3542_v50, %v5029_v57  ;;  %3563 = vrcp.f32 %v2528_v17  ;;  %v2929_v18 = vmul.f32 -1.442695, %v5153_v47  ;;  %v5162_v29 = vadd.f32 %v4947_v25, %v2367_v2 }
 0x247   : > { %v3546_v11 = vpop.eup %3545  ;;  %v2619_v61 = vmul.f32 %v3544_v54, %v5022_v49  ;;  %3565 = vrcp.f32 %v2527_v8  ;;  %v5166_v58 = vadd.f32 %v4947_v25, %v2366_v23  ;;  %v2205_v36 = vadd.f32 %v3349_v60, %v4932_v22 }
 0x248   : > { %v3548_v45 = vpop.eup %3547  ;;  %2635 = vst [vmem:[%s5062_s10] sm:$0xff] %v2603_v52  ;;  %v2510_v51 = vadd.f32 1.0, %v3546_v11  ;;  %3567 = vpow2.f32 %v2948_v6  ;;  %v2951_v57 = vmul.f32 -1.442695, %v5162_v29  ;;  %v2320_v9 = vadd.f32 %v4968_v15, %v5106_v1 }
 0x249   : > { %v3550_v21 = vpop.eup %3549  ;;  %2651 = vst [vmem:[%s5062_s10 + $0x80] sm:$0xff] %v2619_v61  ;;  %v2530_v26 = vadd.f32 1.0, %v3548_v45  ;;  %3569 = vpow2.f32 %v2929_v18  ;;  %v2950_v49 = vmul.f32 -1.442695, %v5166_v58  ;;  %v2346_v63 = vmul.f32 %v4938_v24, %v2205_v36 }
 0x24a   : > { %v3552_v44 = vpop.eup %3551  ;;  %v2622_v22 = vmul.f32 %v3550_v21, %v5034_v34  ;;  %3571 = vrcp.f32 %v2510_v51  ;;  %v2369_v16 = vmul.f32 %v4938_v24, %v2320_v9  ;;  %v2315_v13 = vadd.f32 %v4952_v5, %v5111_v56 }
 0x24b   : > { %v3554_v15 = vpop.eup %3553  ;;  %v2604_v1 = vmul.f32 %v3552_v44, %v5048_v41  ;;  %3573 = vrcp.f32 %v2530_v26  ;;  %v5182_v48 = vadd.f32 %v4947_v25, %v2346_v63  ;;  %v3350_v53 = vadd.f32 %v5132_v28, %v4755_v4 }
 0x24c   : > { %v3556_v62 = vpop.eup %3555  ;;  %2654 = vst [vmem:[%s5062_s10 + $0x98] sm:$0xff] %v2622_v22  ;;  %v2529_v34 = vadd.f32 1.0, %v3554_v15  ;;  %3575 = vpow2.f32 %v2951_v57  ;;  %v5188_v3 = vadd.f32 %v4947_v25, %v2369_v16  ;;  %v2368_v5 = vmul.f32 %v4938_v24, %v2315_v13 }
 0x24d   : > { %v3558_v56 = vpop.eup %3557  ;;  %2636 = vst [vmem:[%s5062_s10 + $0x8] sm:$0xff] %v2604_v1  ;;  %v2621_v41 = vmul.f32 %v3556_v62, %v5043_v32  ;;  %3577 = vpow2.f32 %v2950_v49  ;;  %v2930_v7 = vmul.f32 -1.442695, %v5182_v48  ;;  %v2210_v4 = vadd.f32 %v3350_v53, %v4928_v38 }
 0x24e   : > { %v3560_v28 = vpop.eup %3559  ;;  %v2605_v33 = vmul.f32 %v3558_v56, %v5065_v10  ;;  %3579 = vrcp.f32 %v2529_v34  ;;  %v2953_v42 = vmul.f32 -1.442695, %v5188_v3  ;;  %v5198_v0 = vadd.f32 %v4947_v25, %v2368_v5 }
 0x24f   : > { %v3562_v35 = vpop.eup %3561  ;;  %2653 = vst [vmem:[%s5062_s10 + $0x90] sm:$0xff] %v2621_v41  ;;  %v2511_v6 = vadd.f32 1.0, %v3560_v28  ;;  %3581 = vpow2.f32 %v2930_v7  ;;  %v2347_v32 = vmul.f32 %v4938_v24, %v2210_v4  ;;  %v2330_v46 = vadd.f32 %v5000_v27, %v5125_v43 }
 0x250   : > { %v3564_v40 = vpop.eup %3563  ;;  %2637 = vst [vmem:[%s5062_s10 + $0x10] sm:$0xff] %v2605_v33  ;;  %v2532_v38 = vadd.f32 1.0, %v3562_v35  ;;  %3583 = vpow2.f32 %v2953_v42  ;;  %v2952_v10 = vmul.f32 -1.442695, %v5198_v0  ;;  %v2325_v17 = vadd.f32 %v4984_v31, %v5134_v12 }
 0x251   : > { %v3566_v2 = vpop.eup %3565  ;;  %v2624_v50 = vmul.f32 %v3564_v40, %v5056_v55  ;;  %3585 = vrcp.f32 %v2511_v6  ;;  %v5210_v8 = vadd.f32 %v4947_v25, %v2347_v32  ;;  %v2371_v27 = vmul.f32 %v4938_v24, %v2330_v46 }
 0x252   : > { %v3568_v43 = vpop.eup %3567  ;;  %v2623_v23 = vmul.f32 %v3566_v2, %v5076_v30  ;;  %3587 = vrcp.f32 %v2532_v38  ;;  %v2370_v60 = vmul.f32 %v4938_v24, %v2325_v17 }
 0x253   : > { %v3570_v54 = vpop.eup %3569  ;;  %2656 = vst [vmem:[%s5062_s10 + $0xa8] sm:$0xff] %v2624_v50  ;;  %v2531_v52 = vadd.f32 1.0, %v3568_v43  ;;  %3589 = vpow2.f32 %v2952_v10  ;;  %v2931_v31 = vmul.f32 -1.442695, %v5210_v8  ;;  %v5218_v55 = vadd.f32 %v4947_v25, %v2371_v27 }
 0x254   : > { %v3572_v12 = vpop.eup %3571  ;;  %2655 = vst [vmem:[%s5062_s10 + $0xa0] sm:$0xff] %v2623_v23  ;;  %v2512_v18 = vadd.f32 1.0, %v3570_v54  ;;  %v5222_v11 = vadd.f32 %v4947_v25, %v2370_v60 }
 0x255   : > { %v3574_v30 = vpop.eup %3573  ;;  %v2606_v24 = vmul.f32 %v3572_v12, %v5088_v19  ;;  %3591 = vrcp.f32 %v2531_v52  ;;  %v2955_v61 = vmul.f32 -1.442695, %v5218_v55 }
 0x256   : > { %v3576_v36 = vpop.eup %3575  ;;  %v2626_v45 = vmul.f32 %v3574_v30, %v5099_v39  ;;  %3593 = vrcp.f32 %v2512_v18  ;;  %v2954_v9 = vmul.f32 -1.442695, %v5222_v11 }
 0x257   : > { %v3578_v51 = vpop.eup %3577  ;;  %2638 = vst [vmem:[%s5062_s10 + $0x18] sm:$0xff] %v2606_v24  ;;  %v2534_v57 = vadd.f32 1.0, %v3576_v36  ;;  %3595 = vpow2.f32 %v2931_v31 }
 0x258   : > { %v3580_v21 = vpop.eup %3579  ;;  %2658 = vst [vmem:[%s5062_s10 + $0xb8] sm:$0xff] %v2626_v45  ;;  %v2533_v25 = vadd.f32 1.0, %v3578_v51  ;;  %3597 = vpow2.f32 %v2955_v61 }
 0x259   : > { %v3582_v26 = vpop.eup %3581  ;;  %v2625_v19 = vmul.f32 %v3580_v21, %v5103_v37  ;;  %3599 = vrcp.f32 %v2534_v57 }
 0x25a   : > { %v3584_v49 = vpop.eup %3583  ;;  %3601 = vrcp.f32 %v2533_v25  ;;  %v2513_v39 = vadd.f32 1.0, %v3582_v26 }
 0x25b   : > { %v3586_v63 = vpop.eup %3585  ;;  %2657 = vst [vmem:[%s5062_s10 + $0xb0] sm:$0xff] %v2625_v19  ;;  %v2536_v44 = vadd.f32 1.0, %v3584_v49  ;;  %3603 = vpow2.f32 %v2954_v9 }
 0x25c   : > { %v3588_v22 = vpop.eup %3587  ;;  %v2607_v16 = vmul.f32 %v3586_v63, %v5122_v59  ;;  %3605 = vrcp.f32 %v2513_v39 }
 0x25d   : > { %v3590_v13 = vpop.eup %3589  ;;  %v2628_v15 = vmul.f32 %v3588_v22, %v5129_v20  ;;  %3607 = vrcp.f32 %v2536_v44 }
 0x25e   : > { %2639 = vst [vmem:[%s5062_s10 + $0x20] sm:$0xff] %v2607_v16  ;;  %v2535_v37 = vadd.f32 1.0, %v3590_v13 }
 0x25f   : > { %v3592_v1 = vpop.eup %3591  ;;  %2660 = vst [vmem:[%s5062_s10 + $0xc8] sm:$0xff] %v2628_v15 }
 0x260   : > { %v3594_v53 = vpop.eup %3593  ;;  %v2627_v62 = vmul.f32 %v3592_v1, %v5141_v14  ;;  %3609 = vrcp.f32 %v2535_v37 }
 0x261   : > { %v3596_v34 = vpop.eup %3595  ;;  %v2608_v5 = vmul.f32 %v3594_v53, %v5153_v47 }
 0x262   : > { %v3598_v56 = vpop.eup %3597  ;;  %2659 = vst [vmem:[%s5062_s10 + $0xc0] sm:$0xff] %v2627_v62  ;;  %v2514_v59 = vadd.f32 1.0, %v3596_v34 }
 0x263   : > { %v3600_v41 = vpop.eup %3599  ;;  %2640 = vst [vmem:[%s5062_s10 + $0x28] sm:$0xff] %v2608_v5  ;;  %v2538_v20 = vadd.f32 1.0, %v3598_v56 }
 0x264   : > { %v3602_v7 = vpop.eup %3601  ;;  %v2630_v4 = vmul.f32 %v3600_v41, %v5162_v29  ;;  %3611 = vrcp.f32 %v2514_v59 }
 0x265   : > { %v3604_v14 = vpop.eup %3603  ;;  %v2629_v28 = vmul.f32 %v3602_v7, %v5166_v58  ;;  %3613 = vrcp.f32 %v2538_v20 }
 0x266   : > { %v3606_v33 = vpop.eup %3605  ;;  %2662 = vst [vmem:[%s5062_s10 + $0xd8] sm:$0xff] %v2630_v4  ;;  %v2537_v47 = vadd.f32 1.0, %v3604_v14 }
 0x267   : > { %v3608_v42 = vpop.eup %3607  ;;  %2661 = vst [vmem:[%s5062_s10 + $0xd0] sm:$0xff] %v2629_v28  ;;  %v2609_v35 = vmul.f32 %v3606_v33, %v5182_v48 }
 0x268   : > { %v2632_v6 = vmul.f32 %v3608_v42, %v5188_v3  ;;  %3615 = vrcp.f32 %v2537_v47 }
 0x269   : > { %2641 = vst [vmem:[%s5062_s10 + $0x30] sm:$0xff] %v2609_v35 }
 0x26a   : > { %v3610_v29 = vpop.eup %3609  ;;  %2664 = vst [vmem:[%s5062_s10 + $0xe8] sm:$0xff] %v2632_v6 }
 0x26b   : > { %v2631_v32 = vmul.f32 %v3610_v29, %v5198_v0 }
 0x26d   : > { %2663 = vst [vmem:[%s5062_s10 + $0xe0] sm:$0xff] %v2631_v32 }
 0x26e   : > { %v3612_v58 = vpop.eup %3611 }
 0x26f   : > { %v3614_v46 = vpop.eup %3613  ;;  %v2610_v40 = vmul.f32 %v3612_v58, %v5210_v8 }
 0x270   : > { %v2634_v38 = vmul.f32 %v3614_v46, %v5218_v55 }
 0x271   : > { %2642 = vst [vmem:[%s5062_s10 + $0x38] sm:$0xff] %v2610_v40 }
 0x272   : > { %v3616_v10 = vpop.eup %3615  ;;  %2666 = vst [vmem:[%s5062_s10 + $0xf8] sm:$0xff] %v2634_v38 }
 0x273   : > { %v2633_v48 = vmul.f32 %v3616_v10, %v5222_v11 }
 0x275   : > { %2665 = vst [vmem:[%s5062_s10 + $0xf0] sm:$0xff] %v2633_v48 }
 0x276 PF: > { %s14_s15 = sadd.s32 1, %s3623_s15  }
 0x277   : > { %p11_p4 = scmp.ge.s32.totalorder %s14_s15, 4  }
 0x279   :  { %13 = sbr.rel (!%p11_p4) target bundleno = 1 (0x1), region = 68 }

</bundles_post_ra>
